<compile_context>
chip_gen: v6e
topology: v6e:2x2x1
jax: 0.10.0
libtpu: 0.0.40
codegen_flags: <defaults>
</compile_context>

<pallas_src>
import math
import functools

import numpy as np
import jax
import jax.numpy as jnp
from jax.experimental import pallas as pl
from jax.experimental.pallas import tpu as pltpu

LN_EPS = 1e-5
_GELU_C = math.sqrt(2.0 / math.pi)

CONST_NAMES = ("emb_ln_g", "emb_ln_b", "emb_w", "emb_b",
               "l1_w", "l1_b", "cls_w_t", "cls_b")
LAYER_NAMES = ("ln1_g", "ln1_b", "wqkv", "bqkv", "wo", "bo",
               "ln2_g", "ln2_b", "ff_w1", "ff_b1", "ff_w2", "ff_b2",
               "out_w", "out_b")


# ---------------------------------------------------------------------------
# math helpers usable inside the kernel
# ---------------------------------------------------------------------------
def _gelu(x):
    # tanh-approx GELU: tanh runs on the EUP (separate VLIW slot).
    return 0.5 * x * (1.0 + jnp.tanh(_GELU_C * (x + 0.044715 * x * x * x)))


def _sigmoid(x):
    return 1.0 / (1.0 + jnp.exp(-x))


def _layer_norm(x, gamma, beta):
    mu = jnp.mean(x, axis=-1, keepdims=True)
    var = jnp.mean((x - mu) ** 2, axis=-1, keepdims=True)
    return (x - mu) * jax.lax.rsqrt(var + LN_EPS) * gamma + beta


# ---------------------------------------------------------------------------
# kernel body: one (batch-block, layer) grid step
# ---------------------------------------------------------------------------
def _forward_body(x_ref, pos_ref, cp, lp, o_ref, x_scr, *, num_heads):
    Bt, S, D = x_ref.shape
    T = Bt * S
    H = num_heads
    hd = D // H
    inv_sqrt_hd = 1.0 / math.sqrt(hd)
    bf16 = jnp.bfloat16
    f32 = jnp.float32

    l = pl.program_id(1)
    n_layers = pl.num_programs(1)

    # ---- embedding + positional encoding: only on the first layer step ----
    @pl.when(l == 0)
    def _():
        xin = x_ref[...].reshape(T, D)
        h = _layer_norm(xin, cp["emb_ln_g"][...], cp["emb_ln_b"][...])
        h = jnp.dot(h.astype(bf16), cp["emb_w"][...],
                    preferred_element_type=f32) + cp["emb_b"][...]
        h = jnp.maximum(h, 0.0)                     # relu (dropout = identity)
        # broadcast the (S, D) positional table over the batch block in-kernel
        h = (h.reshape(Bt, S, D) + pos_ref[...][None, :, :]).reshape(T, D)
        x_scr[...] = h

    # ---- one encoder layer (this grid step's streamed weights) ----
    x = x_scr[...]                                  # (T, D) f32 residual stream

    # attention block
    hidden = _layer_norm(x, lp["ln1_g"][0], lp["ln1_b"][0])
    qkv = jnp.dot(hidden.astype(bf16), lp["wqkv"][0],
                  preferred_element_type=f32) + lp["bqkv"][0]     # (T, 3D)

    ctx_heads = []
    for hi in range(H):
        q = qkv[:, hi * hd:(hi + 1) * hd].reshape(Bt, S, hd).astype(bf16)
        k = qkv[:, D + hi * hd:D + (hi + 1) * hd].reshape(Bt, S, hd).astype(bf16)
        v = qkv[:, 2 * D + hi * hd:2 * D + (hi + 1) * hd].reshape(Bt, S, hd).astype(bf16)

        scores = jnp.einsum("bqd,bkd->bqk", q, k,
                            preferred_element_type=f32) * inv_sqrt_hd
        # reference applies F.softmax(dim=1) on (B, Sq, Sk): normalize over the
        # *query* axis -> axis=1 here.
        m = jnp.max(scores, axis=1, keepdims=True)
        e = jnp.exp(scores - m)
        w = e * pl.reciprocal(jnp.sum(e, axis=1, keepdims=True), approx=True)
        ctx = jnp.einsum("bqk,bkd->bqd", w.astype(bf16), v,
                         preferred_element_type=f32)              # (Bt, S, hd)
        ctx_heads.append(ctx.reshape(T, hd).astype(bf16))

    # fused output projection: one (T, D) @ (D, D) matmul (K = D, not head_dim)
    ctx_all = jnp.concatenate(ctx_heads, axis=-1)                 # (T, D) bf16
    attn = jnp.dot(ctx_all, lp["wo"][0],
                   preferred_element_type=f32) + lp["bo"][0]
    x = x + attn

    # feed-forward block
    h2 = _layer_norm(x, lp["ln2_g"][0], lp["ln2_b"][0])
    h2 = jnp.dot(h2.astype(bf16), lp["ff_w1"][0],
                 preferred_element_type=f32) + lp["ff_b1"][0]
    h2 = _gelu(h2)
    h2 = jnp.dot(h2.astype(bf16), lp["ff_w2"][0],
                 preferred_element_type=f32) + lp["ff_b2"][0]
    x = x + h2

    # per-layer output projection (output_size == hidden_size)
    x = jnp.dot(x.astype(bf16), lp["out_w"][0],
                preferred_element_type=f32) + lp["out_b"][0]
    x_scr[...] = x

    # ---- classification head: only on the last layer step ----
    @pl.when(l == n_layers - 1)
    def _():
        xf = x_scr[...]
        h = jnp.dot(xf.astype(bf16), cp["l1_w"][...],
                    preferred_element_type=f32) + cp["l1_b"][...]
        h = _gelu(h)
        # cls weight pre-replicated to (8, D); contracting D of both operands
        # yields a lane-major (8, T) logit matrix -> take row 0 -> lane-dense.
        logits8 = jax.lax.dot_general(
            cp["cls_w_t"][...], h.astype(bf16),
            dimension_numbers=(((1,), (1,)), ((), ())),
            preferred_element_type=f32)                           # (8, T)
        logits = logits8[0:1, :] + cp["cls_b"][...]               # (1, T)
        o_ref[...] = _sigmoid(logits).reshape(1, 1, T)


# ---------------------------------------------------------------------------
# wrapper
# ---------------------------------------------------------------------------
@functools.partial(jax.jit, static_argnames=("num_heads", "block_b"))
def transformer_forward(x, pos, params, *, num_heads, block_b=None):
    B, S, D = x.shape
    if block_b is None:
        # G >= 2 keeps both v7x TensorCores busy via the "parallel" axis.
        block_b = B // 2 if B % 2 == 0 else B
    assert B % block_b == 0
    assert D % num_heads == 0
    G = B // block_b
    T = block_b * S
    L = params["wq"].shape[0]
    bf16 = jnp.bfloat16

    # ---- grid-constant params (embedding + classification head) ----
    cp = {
        "emb_ln_g": params["emb_ln_g"], "emb_ln_b": params["emb_ln_b"],
        "emb_w": params["emb_w"].astype(bf16), "emb_b": params["emb_b"],
        "l1_w": params["l1_w"].astype(bf16), "l1_b": params["l1_b"],
        "cls_w_t": jnp.tile(params["cls_w"].T, (8, 1)).astype(bf16),  # (8, D)
        "cls_b": params["cls_b"],
    }
    # ---- per-layer params, streamed one layer per grid step ----
    lp = {
        "ln1_g": params["ln1_g"][:, None, :], "ln1_b": params["ln1_b"][:, None, :],
        "ln2_g": params["ln2_g"][:, None, :], "ln2_b": params["ln2_b"][:, None, :],
        "wqkv": jnp.concatenate([params["wq"], params["wk"], params["wv"]],
                                axis=-1).astype(bf16),            # (L, D, 3D)
        "bqkv": jnp.concatenate([params["bq"], params["bk"], params["bv"]],
                                axis=-1)[:, None, :],             # (L, 1, 3D)
        "wo": params["wo"].astype(bf16), "bo": params["bo"][:, None, :],
        "ff_w1": params["ff_w1"].astype(bf16), "ff_b1": params["ff_b1"][:, None, :],
        "ff_w2": params["ff_w2"].astype(bf16), "ff_b2": params["ff_b2"][:, None, :],
        "out_w": params["out_w"].astype(bf16), "out_b": params["out_b"][:, None, :],
    }
    const_list = [cp[n] for n in CONST_NAMES]
    layer_list = [lp[n] for n in LAYER_NAMES]

    def kernel(x_ref, pos_ref, *refs):
        nc, nl = len(CONST_NAMES), len(LAYER_NAMES)
        cp_refs = dict(zip(CONST_NAMES, refs[:nc]))
        lp_refs = dict(zip(LAYER_NAMES, refs[nc:nc + nl]))
        o_ref = refs[nc + nl]
        x_scr = refs[nc + nl + 1]
        _forward_body(x_ref, pos_ref, cp_refs, lp_refs, o_ref, x_scr,
                      num_heads=num_heads)

    in_specs = [
        pl.BlockSpec((block_b, S, D), lambda g, l: (g, 0, 0)),   # token block
        pl.BlockSpec((S, D), lambda g, l: (0, 0)),               # pos (S, D)
    ]
    # grid-constant params: fetched once (constant block index)
    for arr in const_list:
        in_specs.append(pl.BlockSpec(arr.shape, lambda g, l: (0, 0)))
    # per-layer params: streamed; layer l+1 prefetched under layer l compute
    for arr in layer_list:
        in_specs.append(
            pl.BlockSpec((1,) + arr.shape[1:], lambda g, l: (l, 0, 0)))

    out = pl.pallas_call(
        kernel,
        out_shape=jax.ShapeDtypeStruct((G, 1, T), jnp.float32),
        grid=(G, L),
        in_specs=in_specs,
        out_specs=pl.BlockSpec((1, 1, T), lambda g, l: (g, 0, 0)),
        scratch_shapes=[pltpu.VMEM((T, D), jnp.float32)],   # residual carry
        compiler_params=pltpu.CompilerParams(
            dimension_semantics=("parallel", "arbitrary")),
    )(x, pos.astype(jnp.float32), *const_list, *layer_list)

    # lane-dense kernel output -> (B, S, 1) in plain JAX
    return out.reshape(B, S, 1)


# ---------------------------------------------------------------------------
# deterministic parameter init (mirrors the shapes in the PyTorch __init__)
# ---------------------------------------------------------------------------
def _linear_init(key, in_dim, out_dim):
    kw, kb = jax.random.split(key)
    bound = 1.0 / math.sqrt(in_dim)
    w = jax.random.uniform(kw, (in_dim, out_dim), jnp.float32, -bound, bound)
    b = jax.random.uniform(kb, (out_dim,), jnp.float32, -bound, bound)
    return w, b


def init_params(key, hidden, inter, num_layers, num_heads):
    D, I, L = hidden, inter, num_layers
    assert D % num_heads == 0
    n_linear = 1 + 7 * L + 2
    keys = list(jax.random.split(key, n_linear))
    ki = iter(keys)

    p = {}
    # Embedding block
    p["emb_ln_g"] = jnp.ones((1, D), jnp.float32)
    p["emb_ln_b"] = jnp.zeros((1, D), jnp.float32)
    w, b = _linear_init(next(ki), D, D)
    p["emb_w"], p["emb_b"] = w, b[None, :]

    # Encoder layers (output_size == hidden_size for all layers here)
    acc = {k: [] for k in ["ln1_g", "ln1_b", "ln2_g", "ln2_b",
                           "wq", "bq", "wk", "bk", "wv", "bv",
                           "wo", "bo", "ff_w1", "ff_b1", "ff_w2", "ff_b2",
                           "out_w", "out_b"]}
    for _ in range(L):
        acc["ln1_g"].append(jnp.ones((D,), jnp.float32))
        acc["ln1_b"].append(jnp.zeros((D,), jnp.float32))
        acc["ln2_g"].append(jnp.ones((D,), jnp.float32))
        acc["ln2_b"].append(jnp.zeros((D,), jnp.float32))
        for wn, bn in [("wq", "bq"), ("wk", "bk"), ("wv", "bv")]:
            # per-head Linear(D, head_dim) projections concatenated -> (D, D)
            w, b = _linear_init(next(ki), D, D)
            acc[wn].append(w); acc[bn].append(b)
        w, b = _linear_init(next(ki), D, D)          # MHA output Linear
        acc["wo"].append(w); acc["bo"].append(b)
        w, b = _linear_init(next(ki), D, I)          # FF conv1
        acc["ff_w1"].append(w); acc["ff_b1"].append(b)
        w, b = _linear_init(next(ki), I, D)          # FF conv2
        acc["ff_w2"].append(w); acc["ff_b2"].append(b)
        w, b = _linear_init(next(ki), D, D)          # per-layer out Linear
        acc["out_w"].append(w); acc["out_b"].append(b)
    for k, v in acc.items():
        p[k] = jnp.stack(v)

    # classification head
    w, b = _linear_init(next(ki), D, D)
    p["l1_w"], p["l1_b"] = w, b[None, :]
    w, b = _linear_init(next(ki), D, 1)
    p["cls_w"], p["cls_b"] = w, b[None, :]
    return p


def get_positional_encoding(seq_len, dim):
    pe = np.zeros((seq_len, dim), dtype=np.float32)
    for t in range(seq_len):
        for i in range(dim // 2):
            pe[t, 2 * i] = np.sin(t / 10000 ** (2 * i / dim))
            pe[t, 2 * i + 1] = np.cos(t / 10000 ** (2 * i / dim))
    return jnp.asarray(pe)


# ---------------------------------------------------------------------------
if __name__ == "__main__":
    B, S, D, INTER = 2, 8, 32, 64      # batch, seq_len, hidden, intermediate
    L, H = 2, 4                        # num encoder layers, num_heads

    key = jax.random.PRNGKey(0)
    kx, kp = jax.random.split(key)
    x = jax.random.normal(kx, (B, S, D), jnp.float32)

    params = init_params(kp, D, INTER, L, H)
    pos = get_positional_encoding(S, D)

    out = transformer_forward(x, pos, params, num_heads=H)
    out = jax.block_until_ready(out)

    assert out.shape == (B, S, 1), out.shape
    assert bool(jnp.all(jnp.isfinite(out)))
    assert bool(jnp.all((out >= 0.0) & (out <= 1.0)))   # sigmoid range sanity
    print("KERNEL_OK")
</pallas_src>

<mosaic_0001>
module attributes {stable_mosaic.version = 11 : i64} {
  func.func @kernel(%arg0: i32, %arg1: i32, %arg2: memref<1x8x32xf32, #tpu.memory_space<vmem>>, %arg3: memref<8x32xf32, #tpu.memory_space<vmem>>, %arg4: memref<1x32xf32, #tpu.memory_space<vmem>>, %arg5: memref<1x32xf32, #tpu.memory_space<vmem>>, %arg6: memref<32x32xbf16, #tpu.memory_space<vmem>>, %arg7: memref<1x32xf32, #tpu.memory_space<vmem>>, %arg8: memref<32x32xbf16, #tpu.memory_space<vmem>>, %arg9: memref<1x32xf32, #tpu.memory_space<vmem>>, %arg10: memref<8x32xbf16, #tpu.memory_space<vmem>>, %arg11: memref<1x1xf32, #tpu.memory_space<vmem>>, %arg12: memref<1x1x32xf32, #tpu.memory_space<vmem>>, %arg13: memref<1x1x32xf32, #tpu.memory_space<vmem>>, %arg14: memref<1x32x96xbf16, #tpu.memory_space<vmem>>, %arg15: memref<1x1x96xf32, #tpu.memory_space<vmem>>, %arg16: memref<1x32x32xbf16, #tpu.memory_space<vmem>>, %arg17: memref<1x1x32xf32, #tpu.memory_space<vmem>>, %arg18: memref<1x1x32xf32, #tpu.memory_space<vmem>>, %arg19: memref<1x1x32xf32, #tpu.memory_space<vmem>>, %arg20: memref<1x32x64xbf16, #tpu.memory_space<vmem>>, %arg21: memref<1x1x64xf32, #tpu.memory_space<vmem>>, %arg22: memref<1x64x32xbf16, #tpu.memory_space<vmem>>, %arg23: memref<1x1x32xf32, #tpu.memory_space<vmem>>, %arg24: memref<1x32x32xbf16, #tpu.memory_space<vmem>>, %arg25: memref<1x1x32xf32, #tpu.memory_space<vmem>>, %arg26: memref<1x1x8xf32, #tpu.memory_space<vmem>>, %arg27: memref<8x32xf32, #tpu.memory_space<vmem>>) attributes {dimension_semantics = [#tpu.dimension_semantics<parallel>, #tpu.dimension_semantics<arbitrary>], iteration_bounds = array<i64: 2, 2>, scalar_prefetch = 0 : i64, scratch_operands = 1 : i64, tpu.core_type = #tpu.core_type<tc>, window_params = [{transform_indices = @transform_0, window_bounds = array<i64: 1, 8, 32>}, {pipeline_mode = #tpu.pipeline_mode<synchronous>, transform_indices = @transform_1, window_bounds = array<i64: 8, 32>}, {pipeline_mode = #tpu.pipeline_mode<synchronous>, transform_indices = @transform_2, window_bounds = array<i64: 1, 32>}, {pipeline_mode = #tpu.pipeline_mode<synchronous>, transform_indices = @transform_3, window_bounds = array<i64: 1, 32>}, {pipeline_mode = #tpu.pipeline_mode<synchronous>, transform_indices = @transform_4, window_bounds = array<i64: 32, 32>}, {pipeline_mode = #tpu.pipeline_mode<synchronous>, transform_indices = @transform_5, window_bounds = array<i64: 1, 32>}, {pipeline_mode = #tpu.pipeline_mode<synchronous>, transform_indices = @transform_6, window_bounds = array<i64: 32, 32>}, {pipeline_mode = #tpu.pipeline_mode<synchronous>, transform_indices = @transform_7, window_bounds = array<i64: 1, 32>}, {pipeline_mode = #tpu.pipeline_mode<synchronous>, transform_indices = @transform_8, window_bounds = array<i64: 8, 32>}, {pipeline_mode = #tpu.pipeline_mode<synchronous>, transform_indices = @transform_9, window_bounds = array<i64: 1, 1>}, {transform_indices = @transform_10, window_bounds = array<i64: 1, 1, 32>}, {transform_indices = @transform_11, window_bounds = array<i64: 1, 1, 32>}, {transform_indices = @transform_12, window_bounds = array<i64: 1, 32, 96>}, {transform_indices = @transform_13, window_bounds = array<i64: 1, 1, 96>}, {transform_indices = @transform_14, window_bounds = array<i64: 1, 32, 32>}, {transform_indices = @transform_15, window_bounds = array<i64: 1, 1, 32>}, {transform_indices = @transform_16, window_bounds = array<i64: 1, 1, 32>}, {transform_indices = @transform_17, window_bounds = array<i64: 1, 1, 32>}, {transform_indices = @transform_18, window_bounds = array<i64: 1, 32, 64>}, {transform_indices = @transform_19, window_bounds = array<i64: 1, 1, 64>}, {transform_indices = @transform_20, window_bounds = array<i64: 1, 64, 32>}, {transform_indices = @transform_21, window_bounds = array<i64: 1, 1, 32>}, {transform_indices = @transform_22, window_bounds = array<i64: 1, 32, 32>}, {transform_indices = @transform_23, window_bounds = array<i64: 1, 1, 32>}, {transform_indices = @transform_24, window_bounds = array<i64: 1, 1, 8>}]} {
    %c0_i32 = arith.constant 0 : i32
    %0 = arith.cmpi eq, %arg1, %c0_i32 : i32
    %1 = arith.extui %0 : i1 to i32
    %c0_i32_0 = arith.constant 0 : i32
    %2 = arith.cmpi ne, %1, %c0_i32_0 : i32
    scf.if %2 {
      %c0_85 = arith.constant 0 : index
      %c0_86 = arith.constant 0 : index
      %c0_87 = arith.constant 0 : index
      %219 = vector.load %arg2[%c0_85, %c0_86, %c0_87] : memref<1x8x32xf32, #tpu.memory_space<vmem>>, vector<1x8x32xf32>
      %220 = vector.shape_cast %219 : vector<1x8x32xf32> to vector<8x32xf32>
      %c0_88 = arith.constant 0 : index
      %c0_89 = arith.constant 0 : index
      %221 = vector.load %arg4[%c0_88, %c0_89] : memref<1x32xf32, #tpu.memory_space<vmem>>, vector<1x32xf32>
      %c0_90 = arith.constant 0 : index
      %c0_91 = arith.constant 0 : index
      %222 = vector.load %arg5[%c0_90, %c0_91] : memref<1x32xf32, #tpu.memory_space<vmem>>, vector<1x32xf32>
      %cst_92 = arith.constant dense<0.000000e+00> : vector<8xf32>
      %223 = vector.multi_reduction <add>, %220, %cst_92 [1] : vector<8x32xf32> to vector<8xf32>
      %224 = vector.shape_cast %223 : vector<8xf32> to vector<8x1xf32>
      %cst_93 = arith.constant 3.200000e+01 : f32
      %225 = vector.broadcast %cst_93 : f32 to vector<8x1xf32>
      %226 = arith.divf %224, %225 : vector<8x1xf32>
      %227 = vector.broadcast %226 : vector<8x1xf32> to vector<8x32xf32>
      %228 = arith.subf %220, %227 : vector<8x32xf32>
      %229 = arith.mulf %228, %228 : vector<8x32xf32>
      %cst_94 = arith.constant dense<0.000000e+00> : vector<8xf32>
      %230 = vector.multi_reduction <add>, %229, %cst_94 [1] : vector<8x32xf32> to vector<8xf32>
      %231 = vector.shape_cast %230 : vector<8xf32> to vector<8x1xf32>
      %cst_95 = arith.constant 3.200000e+01 : f32
      %232 = vector.broadcast %cst_95 : f32 to vector<8x1xf32>
      %233 = arith.divf %231, %232 : vector<8x1xf32>
      %234 = vector.broadcast %226 : vector<8x1xf32> to vector<8x32xf32>
      %235 = arith.subf %220, %234 : vector<8x32xf32>
      %cst_96 = arith.constant 9.99999974E-6 : f32
      %236 = vector.broadcast %cst_96 : f32 to vector<8x1xf32>
      %237 = arith.addf %233, %236 : vector<8x1xf32>
      %238 = math.rsqrt %237 : vector<8x1xf32>
      %239 = vector.broadcast %238 : vector<8x1xf32> to vector<8x32xf32>
      %240 = arith.mulf %235, %239 : vector<8x32xf32>
      %241 = vector.broadcast %221 : vector<1x32xf32> to vector<8x32xf32>
      %242 = arith.mulf %240, %241 : vector<8x32xf32>
      %243 = vector.broadcast %222 : vector<1x32xf32> to vector<8x32xf32>
      %244 = arith.addf %242, %243 : vector<8x32xf32>
      %245 = arith.truncf %244 : vector<8x32xf32> to vector<8x32xbf16>
      %c0_97 = arith.constant 0 : index
      %c0_98 = arith.constant 0 : index
      %246 = vector.load %arg6[%c0_97, %c0_98] : memref<32x32xbf16, #tpu.memory_space<vmem>>, vector<32x32xbf16>
      %cst_99 = arith.constant dense<0.000000e+00> : vector<8x32xf32>
      %247 = tpu.matmul %245, %246, %cst_99 {dimension_numbers = #tpu.dot_dimension_numbers<[1], [0], [0], [1], [0, 0, 1, 1], [], []>} : vector<8x32xbf16>, vector<32x32xbf16>, vector<8x32xf32> -> vector<8x32xf32>
      %c0_100 = arith.constant 0 : index
      %c0_101 = arith.constant 0 : index
      %248 = vector.load %arg7[%c0_100, %c0_101] : memref<1x32xf32, #tpu.memory_space<vmem>>, vector<1x32xf32>
      %249 = vector.broadcast %248 : vector<1x32xf32> to vector<8x32xf32>
      %250 = arith.addf %247, %249 : vector<8x32xf32>
      %cst_102 = arith.constant 0.000000e+00 : f32
      %251 = vector.broadcast %cst_102 : f32 to vector<8x32xf32>
      %252 = arith.maximumf %250, %251 : vector<8x32xf32>
      %253 = vector.shape_cast %252 : vector<8x32xf32> to vector<1x8x32xf32>
      %c0_103 = arith.constant 0 : index
      %c0_104 = arith.constant 0 : index
      %254 = vector.load %arg3[%c0_103, %c0_104] : memref<8x32xf32, #tpu.memory_space<vmem>>, vector<8x32xf32>
      %255 = vector.shape_cast %254 : vector<8x32xf32> to vector<1x8x32xf32>
      %256 = arith.addf %253, %255 : vector<1x8x32xf32>
      %257 = vector.shape_cast %256 : vector<1x8x32xf32> to vector<8x32xf32>
      %c0_105 = arith.constant 0 : index
      %c0_106 = arith.constant 0 : index
      %258 = vector.load %arg27[%c0_105, %c0_106] : memref<8x32xf32, #tpu.memory_space<vmem>>, vector<8x32xf32>
      tpu.vector_store %arg27[%c0_105, %c0_106], %257 {strides = array<i32>} : memref<8x32xf32, #tpu.memory_space<vmem>>, vector<8x32xf32>,
    } else {
    }
    %c0 = arith.constant 0 : index
    %c0_1 = arith.constant 0 : index
    %3 = vector.load %arg27[%c0, %c0_1] : memref<8x32xf32, #tpu.memory_space<vmem>>, vector<8x32xf32>
    %c0_2 = arith.constant 0 : index
    %c0_3 = arith.constant 0 : index
    %c0_4 = arith.constant 0 : index
    %4 = vector.load %arg12[%c0_2, %c0_3, %c0_4] : memref<1x1x32xf32, #tpu.memory_space<vmem>>, vector<1x1x32xf32>
    %5 = vector.shape_cast %4 : vector<1x1x32xf32> to vector<1x32xf32>
    %c0_5 = arith.constant 0 : index
    %c0_6 = arith.constant 0 : index
    %c0_7 = arith.constant 0 : index
    %6 = vector.load %arg13[%c0_5, %c0_6, %c0_7] : memref<1x1x32xf32, #tpu.memory_space<vmem>>, vector<1x1x32xf32>
    %7 = vector.shape_cast %6 : vector<1x1x32xf32> to vector<1x32xf32>
    %cst = arith.constant dense<0.000000e+00> : vector<8xf32>
    %8 = vector.multi_reduction <add>, %3, %cst [1] : vector<8x32xf32> to vector<8xf32>
    %9 = vector.shape_cast %8 : vector<8xf32> to vector<8x1xf32>
    %cst_8 = arith.constant 3.200000e+01 : f32
    %10 = vector.broadcast %cst_8 : f32 to vector<8x1xf32>
    %11 = arith.divf %9, %10 : vector<8x1xf32>
    %12 = vector.broadcast %11 : vector<8x1xf32> to vector<8x32xf32>
    %13 = arith.subf %3, %12 : vector<8x32xf32>
    %14 = arith.mulf %13, %13 : vector<8x32xf32>
    %cst_9 = arith.constant dense<0.000000e+00> : vector<8xf32>
    %15 = vector.multi_reduction <add>, %14, %cst_9 [1] : vector<8x32xf32> to vector<8xf32>
    %16 = vector.shape_cast %15 : vector<8xf32> to vector<8x1xf32>
    %cst_10 = arith.constant 3.200000e+01 : f32
    %17 = vector.broadcast %cst_10 : f32 to vector<8x1xf32>
    %18 = arith.divf %16, %17 : vector<8x1xf32>
    %19 = vector.broadcast %11 : vector<8x1xf32> to vector<8x32xf32>
    %20 = arith.subf %3, %19 : vector<8x32xf32>
    %cst_11 = arith.constant 9.99999974E-6 : f32
    %21 = vector.broadcast %cst_11 : f32 to vector<8x1xf32>
    %22 = arith.addf %18, %21 : vector<8x1xf32>
    %23 = math.rsqrt %22 : vector<8x1xf32>
    %24 = vector.broadcast %23 : vector<8x1xf32> to vector<8x32xf32>
    %25 = arith.mulf %20, %24 : vector<8x32xf32>
    %26 = vector.broadcast %5 : vector<1x32xf32> to vector<8x32xf32>
    %27 = arith.mulf %25, %26 : vector<8x32xf32>
    %28 = vector.broadcast %7 : vector<1x32xf32> to vector<8x32xf32>
    %29 = arith.addf %27, %28 : vector<8x32xf32>
    %30 = arith.truncf %29 : vector<8x32xf32> to vector<8x32xbf16>
    %c0_12 = arith.constant 0 : index
    %c0_13 = arith.constant 0 : index
    %c0_14 = arith.constant 0 : index
    %31 = vector.load %arg14[%c0_12, %c0_13, %c0_14] : memref<1x32x96xbf16, #tpu.memory_space<vmem>>, vector<1x32x96xbf16>
    %32 = vector.shape_cast %31 : vector<1x32x96xbf16> to vector<32x96xbf16>
    %cst_15 = arith.constant dense<0.000000e+00> : vector<8x96xf32>
    %33 = tpu.matmul %30, %32, %cst_15 {dimension_numbers = #tpu.dot_dimension_numbers<[1], [0], [0], [1], [0, 0, 1, 1], [], []>} : vector<8x32xbf16>, vector<32x96xbf16>, vector<8x96xf32> -> vector<8x96xf32>
    %c0_16 = arith.constant 0 : index
    %c0_17 = arith.constant 0 : index
    %c0_18 = arith.constant 0 : index
    %34 = vector.load %arg15[%c0_16, %c0_17, %c0_18] : memref<1x1x96xf32, #tpu.memory_space<vmem>>, vector<1x1x96xf32>
    %35 = vector.shape_cast %34 : vector<1x1x96xf32> to vector<1x96xf32>
    %36 = vector.broadcast %35 : vector<1x96xf32> to vector<8x96xf32>
    %37 = arith.addf %33, %36 : vector<8x96xf32>
    %38 = vector.extract_strided_slice %37 {offsets = [0, 0], sizes = [8, 8], strides = [1, 1]} : vector<8x96xf32> to vector<8x8xf32>
    %39 = vector.shape_cast %38 : vector<8x8xf32> to vector<1x8x8xf32>
    %40 = arith.truncf %39 : vector<1x8x8xf32> to vector<1x8x8xbf16>
    %41 = vector.extract_strided_slice %37 {offsets = [0, 32], sizes = [8, 8], strides = [1, 1]} : vector<8x96xf32> to vector<8x8xf32>
    %42 = vector.shape_cast %41 : vector<8x8xf32> to vector<1x8x8xf32>
    %43 = arith.truncf %42 : vector<1x8x8xf32> to vector<1x8x8xbf16>
    %44 = vector.extract_strided_slice %37 {offsets = [0, 64], sizes = [8, 8], strides = [1, 1]} : vector<8x96xf32> to vector<8x8xf32>
    %45 = vector.shape_cast %44 : vector<8x8xf32> to vector<1x8x8xf32>
    %46 = arith.truncf %45 : vector<1x8x8xf32> to vector<1x8x8xbf16>
    "tpu.trace_start"() <{level = 10 : i32, message = "bqd,bkd->bqk"}> : () -> ()
    %cst_19 = arith.constant dense<0.000000e+00> : vector<1x8x8xf32>
    %47 = tpu.matmul %40, %43, %cst_19 {dimension_numbers = #tpu.dot_dimension_numbers<[2], [2], [1], [1], [0, 0, 0, 1, 1, 1], [0], [0]>} : vector<1x8x8xbf16>, vector<1x8x8xbf16>, vector<1x8x8xf32> -> vector<1x8x8xf32>
    "tpu.trace_stop"() : () -> ()
    %cst_20 = arith.constant 0.353553385 : f32
    %48 = vector.broadcast %cst_20 : f32 to vector<1x8x8xf32>
    %49 = arith.mulf %47, %48 : vector<1x8x8xf32>
    %cst_21 = arith.constant dense<0xFF800000> : vector<1x8xf32>
    %50 = vector.multi_reduction <maximumf>, %49, %cst_21 [1] : vector<1x8x8xf32> to vector<1x8xf32>
    %51 = vector.shape_cast %50 : vector<1x8xf32> to vector<1x1x8xf32>
    %52 = vector.broadcast %51 : vector<1x1x8xf32> to vector<1x8x8xf32>
    %53 = arith.subf %49, %52 : vector<1x8x8xf32>
    %54 = math.exp %53 : vector<1x8x8xf32>
    %cst_22 = arith.constant dense<0.000000e+00> : vector<1x8xf32>
    %55 = vector.multi_reduction <add>, %54, %cst_22 [1] : vector<1x8x8xf32> to vector<1x8xf32>
    %56 = vector.shape_cast %55 : vector<1x8xf32> to vector<1x1x8xf32>
    %57 = tpu.reciprocal %56 {approx = true} : vector<1x1x8xf32> -> vector<1x1x8xf32>
    %58 = vector.broadcast %57 : vector<1x1x8xf32> to vector<1x8x8xf32>
    %59 = arith.mulf %54, %58 : vector<1x8x8xf32>
    %60 = arith.truncf %59 : vector<1x8x8xf32> to vector<1x8x8xbf16>
    "tpu.trace_start"() <{level = 10 : i32, message = "bqk,bkd->bqd"}> : () -> ()
    %cst_23 = arith.constant dense<0.000000e+00> : vector<1x8x8xf32>
    %61 = tpu.matmul %60, %46, %cst_23 {dimension_numbers = #tpu.dot_dimension_numbers<[2], [1], [1], [2], [0, 0, 0, 1, 1, 2], [0], [0]>} : vector<1x8x8xbf16>, vector<1x8x8xbf16>, vector<1x8x8xf32> -> vector<1x8x8xf32>
    "tpu.trace_stop"() : () -> ()
    %62 = vector.shape_cast %61 : vector<1x8x8xf32> to vector<8x8xf32>
    %63 = arith.truncf %62 : vector<8x8xf32> to vector<8x8xbf16>
    %64 = vector.extract_strided_slice %37 {offsets = [0, 8], sizes = [8, 8], strides = [1, 1]} : vector<8x96xf32> to vector<8x8xf32>
    %65 = vector.shape_cast %64 : vector<8x8xf32> to vector<1x8x8xf32>
    %66 = arith.truncf %65 : vector<1x8x8xf32> to vector<1x8x8xbf16>
    %67 = vector.extract_strided_slice %37 {offsets = [0, 40], sizes = [8, 8], strides = [1, 1]} : vector<8x96xf32> to vector<8x8xf32>
    %68 = vector.shape_cast %67 : vector<8x8xf32> to vector<1x8x8xf32>
    %69 = arith.truncf %68 : vector<1x8x8xf32> to vector<1x8x8xbf16>
    %70 = vector.extract_strided_slice %37 {offsets = [0, 72], sizes = [8, 8], strides = [1, 1]} : vector<8x96xf32> to vector<8x8xf32>
    %71 = vector.shape_cast %70 : vector<8x8xf32> to vector<1x8x8xf32>
    %72 = arith.truncf %71 : vector<1x8x8xf32> to vector<1x8x8xbf16>
    "tpu.trace_start"() <{level = 10 : i32, message = "bqd,bkd->bqk"}> : () -> ()
    %cst_24 = arith.constant dense<0.000000e+00> : vector<1x8x8xf32>
    %73 = tpu.matmul %66, %69, %cst_24 {dimension_numbers = #tpu.dot_dimension_numbers<[2], [2], [1], [1], [0, 0, 0, 1, 1, 1], [0], [0]>} : vector<1x8x8xbf16>, vector<1x8x8xbf16>, vector<1x8x8xf32> -> vector<1x8x8xf32>
    "tpu.trace_stop"() : () -> ()
    %cst_25 = arith.constant 0.353553385 : f32
    %74 = vector.broadcast %cst_25 : f32 to vector<1x8x8xf32>
    %75 = arith.mulf %73, %74 : vector<1x8x8xf32>
    %cst_26 = arith.constant dense<0xFF800000> : vector<1x8xf32>
    %76 = vector.multi_reduction <maximumf>, %75, %cst_26 [1] : vector<1x8x8xf32> to vector<1x8xf32>
    %77 = vector.shape_cast %76 : vector<1x8xf32> to vector<1x1x8xf32>
    %78 = vector.broadcast %77 : vector<1x1x8xf32> to vector<1x8x8xf32>
    %79 = arith.subf %75, %78 : vector<1x8x8xf32>
    %80 = math.exp %79 : vector<1x8x8xf32>
    %cst_27 = arith.constant dense<0.000000e+00> : vector<1x8xf32>
    %81 = vector.multi_reduction <add>, %80, %cst_27 [1] : vector<1x8x8xf32> to vector<1x8xf32>
    %82 = vector.shape_cast %81 : vector<1x8xf32> to vector<1x1x8xf32>
    %83 = tpu.reciprocal %82 {approx = true} : vector<1x1x8xf32> -> vector<1x1x8xf32>
    %84 = vector.broadcast %83 : vector<1x1x8xf32> to vector<1x8x8xf32>
    %85 = arith.mulf %80, %84 : vector<1x8x8xf32>
    %86 = arith.truncf %85 : vector<1x8x8xf32> to vector<1x8x8xbf16>
    "tpu.trace_start"() <{level = 10 : i32, message = "bqk,bkd->bqd"}> : () -> ()
    %cst_28 = arith.constant dense<0.000000e+00> : vector<1x8x8xf32>
    %87 = tpu.matmul %86, %72, %cst_28 {dimension_numbers = #tpu.dot_dimension_numbers<[2], [1], [1], [2], [0, 0, 0, 1, 1, 2], [0], [0]>} : vector<1x8x8xbf16>, vector<1x8x8xbf16>, vector<1x8x8xf32> -> vector<1x8x8xf32>
    "tpu.trace_stop"() : () -> ()
    %88 = vector.shape_cast %87 : vector<1x8x8xf32> to vector<8x8xf32>
    %89 = arith.truncf %88 : vector<8x8xf32> to vector<8x8xbf16>
    %90 = vector.extract_strided_slice %37 {offsets = [0, 16], sizes = [8, 8], strides = [1, 1]} : vector<8x96xf32> to vector<8x8xf32>
    %91 = vector.shape_cast %90 : vector<8x8xf32> to vector<1x8x8xf32>
    %92 = arith.truncf %91 : vector<1x8x8xf32> to vector<1x8x8xbf16>
    %93 = vector.extract_strided_slice %37 {offsets = [0, 48], sizes = [8, 8], strides = [1, 1]} : vector<8x96xf32> to vector<8x8xf32>
    %94 = vector.shape_cast %93 : vector<8x8xf32> to vector<1x8x8xf32>
    %95 = arith.truncf %94 : vector<1x8x8xf32> to vector<1x8x8xbf16>
    %96 = vector.extract_strided_slice %37 {offsets = [0, 80], sizes = [8, 8], strides = [1, 1]} : vector<8x96xf32> to vector<8x8xf32>
    %97 = vector.shape_cast %96 : vector<8x8xf32> to vector<1x8x8xf32>
    %98 = arith.truncf %97 : vector<1x8x8xf32> to vector<1x8x8xbf16>
    "tpu.trace_start"() <{level = 10 : i32, message = "bqd,bkd->bqk"}> : () -> ()
    %cst_29 = arith.constant dense<0.000000e+00> : vector<1x8x8xf32>
    %99 = tpu.matmul %92, %95, %cst_29 {dimension_numbers = #tpu.dot_dimension_numbers<[2], [2], [1], [1], [0, 0, 0, 1, 1, 1], [0], [0]>} : vector<1x8x8xbf16>, vector<1x8x8xbf16>, vector<1x8x8xf32> -> vector<1x8x8xf32>
    "tpu.trace_stop"() : () -> ()
    %cst_30 = arith.constant 0.353553385 : f32
    %100 = vector.broadcast %cst_30 : f32 to vector<1x8x8xf32>
    %101 = arith.mulf %99, %100 : vector<1x8x8xf32>
    %cst_31 = arith.constant dense<0xFF800000> : vector<1x8xf32>
    %102 = vector.multi_reduction <maximumf>, %101, %cst_31 [1] : vector<1x8x8xf32> to vector<1x8xf32>
    %103 = vector.shape_cast %102 : vector<1x8xf32> to vector<1x1x8xf32>
    %104 = vector.broadcast %103 : vector<1x1x8xf32> to vector<1x8x8xf32>
    %105 = arith.subf %101, %104 : vector<1x8x8xf32>
    %106 = math.exp %105 : vector<1x8x8xf32>
    %cst_32 = arith.constant dense<0.000000e+00> : vector<1x8xf32>
    %107 = vector.multi_reduction <add>, %106, %cst_32 [1] : vector<1x8x8xf32> to vector<1x8xf32>
    %108 = vector.shape_cast %107 : vector<1x8xf32> to vector<1x1x8xf32>
    %109 = tpu.reciprocal %108 {approx = true} : vector<1x1x8xf32> -> vector<1x1x8xf32>
    %110 = vector.broadcast %109 : vector<1x1x8xf32> to vector<1x8x8xf32>
    %111 = arith.mulf %106, %110 : vector<1x8x8xf32>
    %112 = arith.truncf %111 : vector<1x8x8xf32> to vector<1x8x8xbf16>
    "tpu.trace_start"() <{level = 10 : i32, message = "bqk,bkd->bqd"}> : () -> ()
    %cst_33 = arith.constant dense<0.000000e+00> : vector<1x8x8xf32>
    %113 = tpu.matmul %112, %98, %cst_33 {dimension_numbers = #tpu.dot_dimension_numbers<[2], [1], [1], [2], [0, 0, 0, 1, 1, 2], [0], [0]>} : vector<1x8x8xbf16>, vector<1x8x8xbf16>, vector<1x8x8xf32> -> vector<1x8x8xf32>
    "tpu.trace_stop"() : () -> ()
    %114 = vector.shape_cast %113 : vector<1x8x8xf32> to vector<8x8xf32>
    %115 = arith.truncf %114 : vector<8x8xf32> to vector<8x8xbf16>
    %116 = vector.extract_strided_slice %37 {offsets = [0, 24], sizes = [8, 8], strides = [1, 1]} : vector<8x96xf32> to vector<8x8xf32>
    %117 = vector.shape_cast %116 : vector<8x8xf32> to vector<1x8x8xf32>
    %118 = arith.truncf %117 : vector<1x8x8xf32> to vector<1x8x8xbf16>
    %119 = vector.extract_strided_slice %37 {offsets = [0, 56], sizes = [8, 8], strides = [1, 1]} : vector<8x96xf32> to vector<8x8xf32>
    %120 = vector.shape_cast %119 : vector<8x8xf32> to vector<1x8x8xf32>
    %121 = arith.truncf %120 : vector<1x8x8xf32> to vector<1x8x8xbf16>
    %122 = vector.extract_strided_slice %37 {offsets = [0, 88], sizes = [8, 8], strides = [1, 1]} : vector<8x96xf32> to vector<8x8xf32>
    %123 = vector.shape_cast %122 : vector<8x8xf32> to vector<1x8x8xf32>
    %124 = arith.truncf %123 : vector<1x8x8xf32> to vector<1x8x8xbf16>
    "tpu.trace_start"() <{level = 10 : i32, message = "bqd,bkd->bqk"}> : () -> ()
    %cst_34 = arith.constant dense<0.000000e+00> : vector<1x8x8xf32>
    %125 = tpu.matmul %118, %121, %cst_34 {dimension_numbers = #tpu.dot_dimension_numbers<[2], [2], [1], [1], [0, 0, 0, 1, 1, 1], [0], [0]>} : vector<1x8x8xbf16>, vector<1x8x8xbf16>, vector<1x8x8xf32> -> vector<1x8x8xf32>
    "tpu.trace_stop"() : () -> ()
    %cst_35 = arith.constant 0.353553385 : f32
    %126 = vector.broadcast %cst_35 : f32 to vector<1x8x8xf32>
    %127 = arith.mulf %125, %126 : vector<1x8x8xf32>
    %cst_36 = arith.constant dense<0xFF800000> : vector<1x8xf32>
    %128 = vector.multi_reduction <maximumf>, %127, %cst_36 [1] : vector<1x8x8xf32> to vector<1x8xf32>
    %129 = vector.shape_cast %128 : vector<1x8xf32> to vector<1x1x8xf32>
    %130 = vector.broadcast %129 : vector<1x1x8xf32> to vector<1x8x8xf32>
    %131 = arith.subf %127, %130 : vector<1x8x8xf32>
    %132 = math.exp %131 : vector<1x8x8xf32>
    %cst_37 = arith.constant dense<0.000000e+00> : vector<1x8xf32>
    %133 = vector.multi_reduction <add>, %132, %cst_37 [1] : vector<1x8x8xf32> to vector<1x8xf32>
    %134 = vector.shape_cast %133 : vector<1x8xf32> to vector<1x1x8xf32>
    %135 = tpu.reciprocal %134 {approx = true} : vector<1x1x8xf32> -> vector<1x1x8xf32>
    %136 = vector.broadcast %135 : vector<1x1x8xf32> to vector<1x8x8xf32>
    %137 = arith.mulf %132, %136 : vector<1x8x8xf32>
    %138 = arith.truncf %137 : vector<1x8x8xf32> to vector<1x8x8xbf16>
    "tpu.trace_start"() <{level = 10 : i32, message = "bqk,bkd->bqd"}> : () -> ()
    %cst_38 = arith.constant dense<0.000000e+00> : vector<1x8x8xf32>
    %139 = tpu.matmul %138, %124, %cst_38 {dimension_numbers = #tpu.dot_dimension_numbers<[2], [1], [1], [2], [0, 0, 0, 1, 1, 2], [0], [0]>} : vector<1x8x8xbf16>, vector<1x8x8xbf16>, vector<1x8x8xf32> -> vector<1x8x8xf32>
    "tpu.trace_stop"() : () -> ()
    %140 = vector.shape_cast %139 : vector<1x8x8xf32> to vector<8x8xf32>
    %141 = arith.truncf %140 : vector<8x8xf32> to vector<8x8xbf16>
    %142 = tpu.concatenate %63, %89, %115, %141 in 1 : vector<8x8xbf16>, vector<8x8xbf16>, vector<8x8xbf16>, vector<8x8xbf16> -> vector<8x32xbf16>
    %c0_39 = arith.constant 0 : index
    %c0_40 = arith.constant 0 : index
    %c0_41 = arith.constant 0 : index
    %143 = vector.load %arg16[%c0_39, %c0_40, %c0_41] : memref<1x32x32xbf16, #tpu.memory_space<vmem>>, vector<1x32x32xbf16>
    %144 = vector.shape_cast %143 : vector<1x32x32xbf16> to vector<32x32xbf16>
    %cst_42 = arith.constant dense<0.000000e+00> : vector<8x32xf32>
    %145 = tpu.matmul %142, %144, %cst_42 {dimension_numbers = #tpu.dot_dimension_numbers<[1], [0], [0], [1], [0, 0, 1, 1], [], []>} : vector<8x32xbf16>, vector<32x32xbf16>, vector<8x32xf32> -> vector<8x32xf32>
    %c0_43 = arith.constant 0 : index
    %c0_44 = arith.constant 0 : index
    %c0_45 = arith.constant 0 : index
    %146 = vector.load %arg17[%c0_43, %c0_44, %c0_45] : memref<1x1x32xf32, #tpu.memory_space<vmem>>, vector<1x1x32xf32>
    %147 = vector.shape_cast %146 : vector<1x1x32xf32> to vector<1x32xf32>
    %148 = vector.broadcast %147 : vector<1x32xf32> to vector<8x32xf32>
    %149 = arith.addf %145, %148 : vector<8x32xf32>
    %150 = arith.addf %3, %149 : vector<8x32xf32>
    %c0_46 = arith.constant 0 : index
    %c0_47 = arith.constant 0 : index
    %c0_48 = arith.constant 0 : index
    %151 = vector.load %arg18[%c0_46, %c0_47, %c0_48] : memref<1x1x32xf32, #tpu.memory_space<vmem>>, vector<1x1x32xf32>
    %152 = vector.shape_cast %151 : vector<1x1x32xf32> to vector<1x32xf32>
    %c0_49 = arith.constant 0 : index
    %c0_50 = arith.constant 0 : index
    %c0_51 = arith.constant 0 : index
    %153 = vector.load %arg19[%c0_49, %c0_50, %c0_51] : memref<1x1x32xf32, #tpu.memory_space<vmem>>, vector<1x1x32xf32>
    %154 = vector.shape_cast %153 : vector<1x1x32xf32> to vector<1x32xf32>
    %cst_52 = arith.constant dense<0.000000e+00> : vector<8xf32>
    %155 = vector.multi_reduction <add>, %150, %cst_52 [1] : vector<8x32xf32> to vector<8xf32>
    %156 = vector.shape_cast %155 : vector<8xf32> to vector<8x1xf32>
    %cst_53 = arith.constant 3.200000e+01 : f32
    %157 = vector.broadcast %cst_53 : f32 to vector<8x1xf32>
    %158 = arith.divf %156, %157 : vector<8x1xf32>
    %159 = vector.broadcast %158 : vector<8x1xf32> to vector<8x32xf32>
    %160 = arith.subf %150, %159 : vector<8x32xf32>
    %161 = arith.mulf %160, %160 : vector<8x32xf32>
    %cst_54 = arith.constant dense<0.000000e+00> : vector<8xf32>
    %162 = vector.multi_reduction <add>, %161, %cst_54 [1] : vector<8x32xf32> to vector<8xf32>
    %163 = vector.shape_cast %162 : vector<8xf32> to vector<8x1xf32>
    %cst_55 = arith.constant 3.200000e+01 : f32
    %164 = vector.broadcast %cst_55 : f32 to vector<8x1xf32>
    %165 = arith.divf %163, %164 : vector<8x1xf32>
    %166 = vector.broadcast %158 : vector<8x1xf32> to vector<8x32xf32>
    %167 = arith.subf %150, %166 : vector<8x32xf32>
    %cst_56 = arith.constant 9.99999974E-6 : f32
    %168 = vector.broadcast %cst_56 : f32 to vector<8x1xf32>
    %169 = arith.addf %165, %168 : vector<8x1xf32>
    %170 = math.rsqrt %169 : vector<8x1xf32>
    %171 = vector.broadcast %170 : vector<8x1xf32> to vector<8x32xf32>
    %172 = arith.mulf %167, %171 : vector<8x32xf32>
    %173 = vector.broadcast %152 : vector<1x32xf32> to vector<8x32xf32>
    %174 = arith.mulf %172, %173 : vector<8x32xf32>
    %175 = vector.broadcast %154 : vector<1x32xf32> to vector<8x32xf32>
    %176 = arith.addf %174, %175 : vector<8x32xf32>
    %177 = arith.truncf %176 : vector<8x32xf32> to vector<8x32xbf16>
    %c0_57 = arith.constant 0 : index
    %c0_58 = arith.constant 0 : index
    %c0_59 = arith.constant 0 : index
    %178 = vector.load %arg20[%c0_57, %c0_58, %c0_59] : memref<1x32x64xbf16, #tpu.memory_space<vmem>>, vector<1x32x64xbf16>
    %179 = vector.shape_cast %178 : vector<1x32x64xbf16> to vector<32x64xbf16>
    %cst_60 = arith.constant dense<0.000000e+00> : vector<8x64xf32>
    %180 = tpu.matmul %177, %179, %cst_60 {dimension_numbers = #tpu.dot_dimension_numbers<[1], [0], [0], [1], [0, 0, 1, 1], [], []>} : vector<8x32xbf16>, vector<32x64xbf16>, vector<8x64xf32> -> vector<8x64xf32>
    %c0_61 = arith.constant 0 : index
    %c0_62 = arith.constant 0 : index
    %c0_63 = arith.constant 0 : index
    %181 = vector.load %arg21[%c0_61, %c0_62, %c0_63] : memref<1x1x64xf32, #tpu.memory_space<vmem>>, vector<1x1x64xf32>
    %182 = vector.shape_cast %181 : vector<1x1x64xf32> to vector<1x64xf32>
    %183 = vector.broadcast %182 : vector<1x64xf32> to vector<8x64xf32>
    %184 = arith.addf %180, %183 : vector<8x64xf32>
    %cst_64 = arith.constant 5.000000e-01 : f32
    %185 = vector.broadcast %cst_64 : f32 to vector<8x64xf32>
    %186 = arith.mulf %185, %184 : vector<8x64xf32>
    %cst_65 = arith.constant 4.471500e-02 : f32
    %187 = vector.broadcast %cst_65 : f32 to vector<8x64xf32>
    %188 = arith.mulf %187, %184 : vector<8x64xf32>
    %189 = arith.mulf %188, %184 : vector<8x64xf32>
    %190 = arith.mulf %189, %184 : vector<8x64xf32>
    %191 = arith.addf %184, %190 : vector<8x64xf32>
    %cst_66 = arith.constant 0.797884583 : f32
    %192 = vector.broadcast %cst_66 : f32 to vector<8x64xf32>
    %193 = arith.mulf %192, %191 : vector<8x64xf32>
    %194 = math.tanh %193 : vector<8x64xf32>
    %cst_67 = arith.constant 1.000000e+00 : f32
    %195 = vector.broadcast %cst_67 : f32 to vector<8x64xf32>
    %196 = arith.addf %195, %194 : vector<8x64xf32>
    %197 = arith.mulf %186, %196 : vector<8x64xf32>
    %198 = arith.truncf %197 : vector<8x64xf32> to vector<8x64xbf16>
    %c0_68 = arith.constant 0 : index
    %c0_69 = arith.constant 0 : index
    %c0_70 = arith.constant 0 : index
    %199 = vector.load %arg22[%c0_68, %c0_69, %c0_70] : memref<1x64x32xbf16, #tpu.memory_space<vmem>>, vector<1x64x32xbf16>
    %200 = vector.shape_cast %199 : vector<1x64x32xbf16> to vector<64x32xbf16>
    %cst_71 = arith.constant dense<0.000000e+00> : vector<8x32xf32>
    %201 = tpu.matmul %198, %200, %cst_71 {dimension_numbers = #tpu.dot_dimension_numbers<[1], [0], [0], [1], [0, 0, 1, 1], [], []>} : vector<8x64xbf16>, vector<64x32xbf16>, vector<8x32xf32> -> vector<8x32xf32>
    %c0_72 = arith.constant 0 : index
    %c0_73 = arith.constant 0 : index
    %c0_74 = arith.constant 0 : index
    %202 = vector.load %arg23[%c0_72, %c0_73, %c0_74] : memref<1x1x32xf32, #tpu.memory_space<vmem>>, vector<1x1x32xf32>
    %203 = vector.shape_cast %202 : vector<1x1x32xf32> to vector<1x32xf32>
    %204 = vector.broadcast %203 : vector<1x32xf32> to vector<8x32xf32>
    %205 = arith.addf %201, %204 : vector<8x32xf32>
    %206 = arith.addf %150, %205 : vector<8x32xf32>
    %207 = arith.truncf %206 : vector<8x32xf32> to vector<8x32xbf16>
    %c0_75 = arith.constant 0 : index
    %c0_76 = arith.constant 0 : index
    %c0_77 = arith.constant 0 : index
    %208 = vector.load %arg24[%c0_75, %c0_76, %c0_77] : memref<1x32x32xbf16, #tpu.memory_space<vmem>>, vector<1x32x32xbf16>
    %209 = vector.shape_cast %208 : vector<1x32x32xbf16> to vector<32x32xbf16>
    %cst_78 = arith.constant dense<0.000000e+00> : vector<8x32xf32>
    %210 = tpu.matmul %207, %209, %cst_78 {dimension_numbers = #tpu.dot_dimension_numbers<[1], [0], [0], [1], [0, 0, 1, 1], [], []>} : vector<8x32xbf16>, vector<32x32xbf16>, vector<8x32xf32> -> vector<8x32xf32>
    %c0_79 = arith.constant 0 : index
    %c0_80 = arith.constant 0 : index
    %c0_81 = arith.constant 0 : index
    %211 = vector.load %arg25[%c0_79, %c0_80, %c0_81] : memref<1x1x32xf32, #tpu.memory_space<vmem>>, vector<1x1x32xf32>
    %212 = vector.shape_cast %211 : vector<1x1x32xf32> to vector<1x32xf32>
    %213 = vector.broadcast %212 : vector<1x32xf32> to vector<8x32xf32>
    %214 = arith.addf %210, %213 : vector<8x32xf32>
    %c0_82 = arith.constant 0 : index
    %c0_83 = arith.constant 0 : index
    %215 = vector.load %arg27[%c0_82, %c0_83] : memref<8x32xf32, #tpu.memory_space<vmem>>, vector<8x32xf32>
    tpu.vector_store %arg27[%c0_82, %c0_83], %214 {strides = array<i32>} : memref<8x32xf32, #tpu.memory_space<vmem>>, vector<8x32xf32>,
    %c1_i32 = arith.constant 1 : i32
    %216 = arith.cmpi eq, %arg1, %c1_i32 : i32
    %217 = arith.extui %216 : i1 to i32
    %c0_i32_84 = arith.constant 0 : i32
    %218 = arith.cmpi ne, %217, %c0_i32_84 : i32
    scf.if %218 {
      %c0_85 = arith.constant 0 : index
      %c0_86 = arith.constant 0 : index
      %219 = vector.load %arg27[%c0_85, %c0_86] : memref<8x32xf32, #tpu.memory_space<vmem>>, vector<8x32xf32>
      %220 = arith.truncf %219 : vector<8x32xf32> to vector<8x32xbf16>
      %c0_87 = arith.constant 0 : index
      %c0_88 = arith.constant 0 : index
      %221 = vector.load %arg8[%c0_87, %c0_88] : memref<32x32xbf16, #tpu.memory_space<vmem>>, vector<32x32xbf16>
      %cst_89 = arith.constant dense<0.000000e+00> : vector<8x32xf32>
      %222 = tpu.matmul %220, %221, %cst_89 {dimension_numbers = #tpu.dot_dimension_numbers<[1], [0], [0], [1], [0, 0, 1, 1], [], []>} : vector<8x32xbf16>, vector<32x32xbf16>, vector<8x32xf32> -> vector<8x32xf32>
      %c0_90 = arith.constant 0 : index
      %c0_91 = arith.constant 0 : index
      %223 = vector.load %arg9[%c0_90, %c0_91] : memref<1x32xf32, #tpu.memory_space<vmem>>, vector<1x32xf32>
      %224 = vector.broadcast %223 : vector<1x32xf32> to vector<8x32xf32>
      %225 = arith.addf %222, %224 : vector<8x32xf32>
      %cst_92 = arith.constant 5.000000e-01 : f32
      %226 = vector.broadcast %cst_92 : f32 to vector<8x32xf32>
      %227 = arith.mulf %226, %225 : vector<8x32xf32>
      %cst_93 = arith.constant 4.471500e-02 : f32
      %228 = vector.broadcast %cst_93 : f32 to vector<8x32xf32>
      %229 = arith.mulf %228, %225 : vector<8x32xf32>
      %230 = arith.mulf %229, %225 : vector<8x32xf32>
      %231 = arith.mulf %230, %225 : vector<8x32xf32>
      %232 = arith.addf %225, %231 : vector<8x32xf32>
      %cst_94 = arith.constant 0.797884583 : f32
      %233 = vector.broadcast %cst_94 : f32 to vector<8x32xf32>
      %234 = arith.mulf %233, %232 : vector<8x32xf32>
      %235 = math.tanh %234 : vector<8x32xf32>
      %cst_95 = arith.constant 1.000000e+00 : f32
      %236 = vector.broadcast %cst_95 : f32 to vector<8x32xf32>
      %237 = arith.addf %236, %235 : vector<8x32xf32>
      %238 = arith.mulf %227, %237 : vector<8x32xf32>
      %c0_96 = arith.constant 0 : index
      %c0_97 = arith.constant 0 : index
      %239 = vector.load %arg10[%c0_96, %c0_97] : memref<8x32xbf16, #tpu.memory_space<vmem>>, vector<8x32xbf16>
      %240 = arith.truncf %238 : vector<8x32xf32> to vector<8x32xbf16>
      %cst_98 = arith.constant dense<0.000000e+00> : vector<8x8xf32>
      %241 = tpu.matmul %239, %240, %cst_98 {dimension_numbers = #tpu.dot_dimension_numbers<[1], [1], [0], [0], [0, 0, 1, 0], [], []>} : vector<8x32xbf16>, vector<8x32xbf16>, vector<8x8xf32> -> vector<8x8xf32>
      %242 = vector.extract_strided_slice %241 {offsets = [0, 0], sizes = [1, 8], strides = [1, 1]} : vector<8x8xf32> to vector<1x8xf32>
      %c0_99 = arith.constant 0 : index
      %c0_100 = arith.constant 0 : index
      %243 = vector.load %arg11[%c0_99, %c0_100] : memref<1x1xf32, #tpu.memory_space<vmem>>, vector<1x1xf32>
      %244 = vector.broadcast %243 : vector<1x1xf32> to vector<1x8xf32>
      %245 = arith.addf %242, %244 : vector<1x8xf32>
      %cst_101 = arith.constant 0.000000e+00 : f32
      %246 = vector.broadcast %cst_101 : f32 to vector<1x8xf32>
      %247 = arith.subf %246, %245 : vector<1x8xf32>
      %248 = math.exp %247 : vector<1x8xf32>
      %cst_102 = arith.constant 1.000000e+00 : f32
      %249 = vector.broadcast %cst_102 : f32 to vector<1x8xf32>
      %250 = arith.addf %249, %248 : vector<1x8xf32>
      %cst_103 = arith.constant 1.000000e+00 : f32
      %251 = vector.broadcast %cst_103 : f32 to vector<1x8xf32>
      %252 = arith.divf %251, %250 : vector<1x8xf32>
      %253 = vector.shape_cast %252 : vector<1x8xf32> to vector<1x1x8xf32>
      %c0_104 = arith.constant 0 : index
      %c0_105 = arith.constant 0 : index
      %c0_106 = arith.constant 0 : index
      %254 = vector.load %arg26[%c0_104, %c0_105, %c0_106] : memref<1x1x8xf32, #tpu.memory_space<vmem>>, vector<1x1x8xf32>
      tpu.vector_store %arg26[%c0_104, %c0_105, %c0_106], %253 {strides = array<i32>} : memref<1x1x8xf32, #tpu.memory_space<vmem>>, vector<1x1x8xf32>,
    } else {
    }
    return
  }
  func.func @transform_0(%arg0: i32, %arg1: i32) -> (i32, i32, i32) {
    %c0_i32 = arith.constant 0 : i32
    %c0_i32_0 = arith.constant 0 : i32
    %c0_i32_1 = arith.constant 0 : i32
    return %arg0, %c0_i32, %c0_i32_0 : i32, i32, i32
  }
  func.func @transform_1(%arg0: i32, %arg1: i32) -> (i32, i32) {
    %c0_i32 = arith.constant 0 : i32
    %c0_i32_0 = arith.constant 0 : i32
    %c0_i32_1 = arith.constant 0 : i32
    return %c0_i32, %c0_i32_0 : i32, i32
  }
  func.func @transform_2(%arg0: i32, %arg1: i32) -> (i32, i32) {
    %c0_i32 = arith.constant 0 : i32
    %c0_i32_0 = arith.constant 0 : i32
    %c0_i32_1 = arith.constant 0 : i32
    return %c0_i32, %c0_i32_0 : i32, i32
  }
  func.func @transform_3(%arg0: i32, %arg1: i32) -> (i32, i32) {
    %c0_i32 = arith.constant 0 : i32
    %c0_i32_0 = arith.constant 0 : i32
    %c0_i32_1 = arith.constant 0 : i32
    return %c0_i32, %c0_i32_0 : i32, i32
  }
  func.func @transform_4(%arg0: i32, %arg1: i32) -> (i32, i32) {
    %c0_i32 = arith.constant 0 : i32
    %c0_i32_0 = arith.constant 0 : i32
    %c0_i32_1 = arith.constant 0 : i32
    return %c0_i32, %c0_i32_0 : i32, i32
  }
  func.func @transform_5(%arg0: i32, %arg1: i32) -> (i32, i32) {
    %c0_i32 = arith.constant 0 : i32
    %c0_i32_0 = arith.constant 0 : i32
    %c0_i32_1 = arith.constant 0 : i32
    return %c0_i32, %c0_i32_0 : i32, i32
  }
  func.func @transform_6(%arg0: i32, %arg1: i32) -> (i32, i32) {
    %c0_i32 = arith.constant 0 : i32
    %c0_i32_0 = arith.constant 0 : i32
    %c0_i32_1 = arith.constant 0 : i32
    return %c0_i32, %c0_i32_0 : i32, i32
  }
  func.func @transform_7(%arg0: i32, %arg1: i32) -> (i32, i32) {
    %c0_i32 = arith.constant 0 : i32
    %c0_i32_0 = arith.constant 0 : i32
    %c0_i32_1 = arith.constant 0 : i32
    return %c0_i32, %c0_i32_0 : i32, i32
  }
  func.func @transform_8(%arg0: i32, %arg1: i32) -> (i32, i32) {
    %c0_i32 = arith.constant 0 : i32
    %c0_i32_0 = arith.constant 0 : i32
    %c0_i32_1 = arith.constant 0 : i32
    return %c0_i32, %c0_i32_0 : i32, i32
  }
  func.func @transform_9(%arg0: i32, %arg1: i32) -> (i32, i32) {
    %c0_i32 = arith.constant 0 : i32
    %c0_i32_0 = arith.constant 0 : i32
    %c0_i32_1 = arith.constant 0 : i32
    return %c0_i32, %c0_i32_0 : i32, i32
  }
  func.func @transform_10(%arg0: i32, %arg1: i32) -> (i32, i32, i32) {
    %c0_i32 = arith.constant 0 : i32
    %c0_i32_0 = arith.constant 0 : i32
    %c0_i32_1 = arith.constant 0 : i32
    return %arg1, %c0_i32, %c0_i32_0 : i32, i32, i32
  }
  func.func @transform_11(%arg0: i32, %arg1: i32) -> (i32, i32, i32) {
    %c0_i32 = arith.constant 0 : i32
    %c0_i32_0 = arith.constant 0 : i32
    %c0_i32_1 = arith.constant 0 : i32
    return %arg1, %c0_i32, %c0_i32_0 : i32, i32, i32
  }
  func.func @transform_12(%arg0: i32, %arg1: i32) -> (i32, i32, i32) {
    %c0_i32 = arith.constant 0 : i32
    %c0_i32_0 = arith.constant 0 : i32
    %c0_i32_1 = arith.constant 0 : i32
    return %arg1, %c0_i32, %c0_i32_0 : i32, i32, i32
  }
  func.func @transform_13(%arg0: i32, %arg1: i32) -> (i32, i32, i32) {
    %c0_i32 = arith.constant 0 : i32
    %c0_i32_0 = arith.constant 0 : i32
    %c0_i32_1 = arith.constant 0 : i32
    return %arg1, %c0_i32, %c0_i32_0 : i32, i32, i32
  }
  func.func @transform_14(%arg0: i32, %arg1: i32) -> (i32, i32, i32) {
    %c0_i32 = arith.constant 0 : i32
    %c0_i32_0 = arith.constant 0 : i32
    %c0_i32_1 = arith.constant 0 : i32
    return %arg1, %c0_i32, %c0_i32_0 : i32, i32, i32
  }
  func.func @transform_15(%arg0: i32, %arg1: i32) -> (i32, i32, i32) {
    %c0_i32 = arith.constant 0 : i32
    %c0_i32_0 = arith.constant 0 : i32
    %c0_i32_1 = arith.constant 0 : i32
    return %arg1, %c0_i32, %c0_i32_0 : i32, i32, i32
  }
  func.func @transform_16(%arg0: i32, %arg1: i32) -> (i32, i32, i32) {
    %c0_i32 = arith.constant 0 : i32
    %c0_i32_0 = arith.constant 0 : i32
    %c0_i32_1 = arith.constant 0 : i32
    return %arg1, %c0_i32, %c0_i32_0 : i32, i32, i32
  }
  func.func @transform_17(%arg0: i32, %arg1: i32) -> (i32, i32, i32) {
    %c0_i32 = arith.constant 0 : i32
    %c0_i32_0 = arith.constant 0 : i32
    %c0_i32_1 = arith.constant 0 : i32
    return %arg1, %c0_i32, %c0_i32_0 : i32, i32, i32
  }
  func.func @transform_18(%arg0: i32, %arg1: i32) -> (i32, i32, i32) {
    %c0_i32 = arith.constant 0 : i32
    %c0_i32_0 = arith.constant 0 : i32
    %c0_i32_1 = arith.constant 0 : i32
    return %arg1, %c0_i32, %c0_i32_0 : i32, i32, i32
  }
  func.func @transform_19(%arg0: i32, %arg1: i32) -> (i32, i32, i32) {
    %c0_i32 = arith.constant 0 : i32
    %c0_i32_0 = arith.constant 0 : i32
    %c0_i32_1 = arith.constant 0 : i32
    return %arg1, %c0_i32, %c0_i32_0 : i32, i32, i32
  }
  func.func @transform_20(%arg0: i32, %arg1: i32) -> (i32, i32, i32) {
    %c0_i32 = arith.constant 0 : i32
    %c0_i32_0 = arith.constant 0 : i32
    %c0_i32_1 = arith.constant 0 : i32
    return %arg1, %c0_i32, %c0_i32_0 : i32, i32, i32
  }
  func.func @transform_21(%arg0: i32, %arg1: i32) -> (i32, i32, i32) {
    %c0_i32 = arith.constant 0 : i32
    %c0_i32_0 = arith.constant 0 : i32
    %c0_i32_1 = arith.constant 0 : i32
    return %arg1, %c0_i32, %c0_i32_0 : i32, i32, i32
  }
  func.func @transform_22(%arg0: i32, %arg1: i32) -> (i32, i32, i32) {
    %c0_i32 = arith.constant 0 : i32
    %c0_i32_0 = arith.constant 0 : i32
    %c0_i32_1 = arith.constant 0 : i32
    return %arg1, %c0_i32, %c0_i32_0 : i32, i32, i32
  }
  func.func @transform_23(%arg0: i32, %arg1: i32) -> (i32, i32, i32) {
    %c0_i32 = arith.constant 0 : i32
    %c0_i32_0 = arith.constant 0 : i32
    %c0_i32_1 = arith.constant 0 : i32
    return %arg1, %c0_i32, %c0_i32_0 : i32, i32, i32
  }
  func.func @transform_24(%arg0: i32, %arg1: i32) -> (i32, i32, i32) {
    %c0_i32 = arith.constant 0 : i32
    %c0_i32_0 = arith.constant 0 : i32
    %c0_i32_1 = arith.constant 0 : i32
    return %arg0, %c0_i32, %c0_i32_0 : i32, i32, i32
  }
}

</mosaic_0001>

<bundles_post_ra>
// kernel: transformer_forward.1
= control target key start
LH: loop header
LB: loop body
LE: loop exit
PB: predicated region body
PF: predicated region fallthrough
CT: control target
= control target key end

     0   :  { %s3360_s0 = inlined_call_operand.vmem [shape: f32[2,8,32], index: 0, kind: input, shape index: {}]   ;;  %s3361_s1 = inlined_call_operand.vmem [shape: f32[8,32], index: 1, kind: input, shape index: {}]   ;;  %s3362_s2 = inlined_call_operand.vmem [shape: f32[1,32], index: 2, kind: input, shape index: {}]   ;;  %s3363_s3 = inlined_call_operand.vmem [shape: f32[1,32], index: 3, kind: input, shape index: {}]   ;;  %s3364_s4 = inlined_call_operand.vmem [shape: bf16[32,32], index: 4, kind: input, shape index: {}]   ;;  %s3365_s5 = inlined_call_operand.vmem [shape: f32[1,32], index: 5, kind: input, shape index: {}]   ;;  %s3366_s6 = inlined_call_operand.vmem [shape: bf16[32,32], index: 6, kind: input, shape index: {}]   ;;  %s3367_s7 = inlined_call_operand.vmem [shape: f32[1,32], index: 7, kind: input, shape index: {}]   ;;  %s3368_s8 = inlined_call_operand.vmem [shape: bf16[8,32], index: 8, kind: input, shape index: {}]   ;;  %s3369_s9 = inlined_call_operand.<no memory space> [shape: f32[1,1], index: 9, kind: input, shape index: {}]   ;;  %s3370_s10 = inlined_call_operand.vmem [shape: f32[2,1,32], index: 10, kind: input, shape index: {}]   ;;  %s3371_s11 = inlined_call_operand.vmem [shape: f32[2,1,32], index: 11, kind: input, shape index: {}]   ;;  %s3372_s12 = inlined_call_operand.vmem [shape: bf16[2,32,96], index: 12, kind: input, shape index: {}]   ;;  %s3373_s13 = inlined_call_operand.vmem [shape: f32[2,1,96], index: 13, kind: input, shape index: {}]   ;;  %s3374_s14 = inlined_call_operand.vmem [shape: bf16[2,32,32], index: 14, kind: input, shape index: {}]   ;;  %s3375_s15 = inlined_call_operand.vmem [shape: f32[2,1,32], index: 15, kind: input, shape index: {}]   ;;  %s3376_s16 = inlined_call_operand.vmem [shape: f32[2,1,32], index: 16, kind: input, shape index: {}]   ;;  %s3377_s17 = inlined_call_operand.vmem [shape: f32[2,1,32], index: 17, kind: input, shape index: {}]   ;;  %s3378_s18 = inlined_call_operand.vmem [shape: bf16[2,32,64], index: 18, kind: input, shape index: {}]   ;;  %s3379_s19 = inlined_call_operand.vmem [shape: f32[2,1,64], index: 19, kind: input, shape index: {}]   ;;  %s3380_s20 = inlined_call_operand.vmem [shape: bf16[2,64,32], index: 20, kind: input, shape index: {}]   ;;  %s3381_s21 = inlined_call_operand.vmem [shape: f32[2,1,32], index: 21, kind: input, shape index: {}]   ;;  %s3382_s22 = inlined_call_operand.vmem [shape: bf16[2,32,32], index: 22, kind: input, shape index: {}]   ;;  %s3383_s23 = inlined_call_operand.vmem [shape: f32[2,1,32], index: 23, kind: input, shape index: {}]   ;;  %s3384_s24 = inlined_call_operand.hbm [shape: f32[2,1,8], index: 24, kind: output, shape index: {}]  }
   0x1   :  { %3400 = sst [smem:[#allocation19_spill]] %s3360_s0  ;;  %v29_v0 = vstv %s3369_s9 }
   0x2   :  { %3401 = sst [smem:[#allocation20_spill]] %s3361_s1  ;;  %30 = vst [vmem:[#allocation3] sm:$0x1] %v29_v0 }
   0x3   :  { %3402 = sst [smem:[#allocation21_spill]] %s3362_s2 }
   0x4   :  { %3403 = sst [smem:[#allocation22_spill]] %s3363_s3 }
   0x5   :  { %3404 = sst [smem:[#allocation23_spill]] %s3364_s4 }
   0x6   :  { %3405 = sst [smem:[#allocation24_spill]] %s3365_s5 }
   0x7   :  { %3406 = sst [smem:[#allocation25_spill]] %s3366_s6 }
   0x8   :  { %3407 = sst [smem:[#allocation26_spill]] %s3367_s7 }
   0x9   :  { %3408 = sst [smem:[#allocation27_spill]] %s3368_s8 }
   0xa   :  { %3409 = sst [smem:[#allocation28_spill]] %s3371_s11 }
   0xb   :  { %3410 = sst [smem:[#allocation29_spill]] %s3372_s12 }
   0xc   :  { %3411 = sst [smem:[#allocation30_spill]] %s3374_s14 }
   0xd   :  { %3412 = sst [smem:[#allocation31_spill]] %s3377_s17 }
   0xe   :  { %3413 = sst [smem:[#allocation32_spill]] %s3378_s18 }
   0xf   :  { %3414 = sst [smem:[#allocation33_spill]] %s3379_s19 }
  0x10   :  { %3415 = sst [smem:[#allocation34_spill]] %s3382_s22 }
  0x11   :  { %3416 = sst [smem:[#allocation35_spill]] %s3383_s23 }
  0x12   :  { %3417 = sst [smem:[#allocation36_spill]] %s3384_s24 }
  0x13   :  { %31 = vsyncpa [#allocation5], 0 }
  0x14   :  { %33 = vsyncpa [#allocation5 + $0x1], 0  ;;  %s2980_s27 = smov 0   ;;  %s2982_s28 = smov 0  }
  0x15   :  { %s2984_s6 = smov 0   ;;  %s2986_s2 = smov 0  }
  0x16   :  { %s2988_s29 = smov 0   ;;  %s2990_s0 = smov 0  }
  0x17   :  { %s2992_s7 = smov 0   ;;  %s2994_s30 = smov 0  }
  0x18 LB: > { %3418 = sst [smem:[#allocation7_spill]] %s2800_s27  ;;  %s2371_s9 = sadd.s32 4294967295, %s2828_s30   ;;  %s2828_s30 = sphi %s2994_s30, %s39_s30   ;;  %s2824_s7 = sphi %s2992_s7, %s3476_s7   ;;  %s2820_s0 = sphi %s2990_s0, %s3475_s0   ;;  %s2816_s29 = sphi %s2988_s29, %s3474_s29   ;;  %s2812_s2 = sphi %s2986_s2, %s3473_s2   ;;  %s2808_s6 = sphi %s2984_s6, %s3472_s6   ;;  %s2804_s28 = sphi %s2982_s28, %s3478_s28   ;;  %s2800_s27 = sphi %s2980_s27, %s3477_s27  }
  0x19   : > { %3419 = sst [smem:[#allocation8_spill]] %s2808_s6  ;;  %s2372_s3 = sadd.s32 4294967294, %s2828_s30  }
  0x1a   : > { %3420 = sst [smem:[#allocation9_spill]] %s2812_s2  ;;  %s48_s25 = sadd.s32 1, %s2820_s0 }
  0x1b   : > { %3421 = sst [smem:[#allocation10_spill]] %s2816_s29  ;;  %p49_p0 = scmp.ge.s32.totalorder %s48_s25, 2 }
  0x1c   : > { %3422 = sst [smem:[#allocation11_spill]] %s2820_s0  ;;  %s51_s8 = sadd.s32 1, %s2824_s7 }
  0x1d   : > { %3423 = sst [smem:[#allocation12_spill]] %s2824_s7  ;;  %p647_p1 = scmp.ne.s32.totalorder %s2808_s6, %s2804_s28 }
  0x1e   : > { %3424 = sst [smem:[#allocation13_spill]] %s2828_s30  ;;  %p648_p2 = scmp.eq.s32.totalorder %s2371_s9, 3 }
  0x1f   : > { %s3480_s25 = smov (%p49_p0, %s48_s25), 0  ;;  %s3482_s8 = smov (!%p49_p0, %s51_s8), %s2824_s7 }
  0x20   : > { %3425 = sst [smem:[#allocation14_spill]] %s3480_s25  ;;  %p3029_p3 = por %p648_p2, %p647_p1 }
  0x21   : > { %p653_p4 = scmp.ne.s32.totalorder %s2804_s28, %s2800_s27  ;;  %p53_p5 = scmp.ge.s32.totalorder %s3482_s8, 2 }
  0x22   : > { %s3426_s4 = scalar_select %p3029_p3, 1, 0 }
  0x23   : > { %p654_p6 = scmp.eq.s32.totalorder %s2372_s3, 3  ;;  %p2375_p7 = scmp.ge.s32.totalorder %s2828_s30, 1 }
  0x24   : > { %3427 = sst [smem:[#allocation15_spill]] %s3426_s4  ;;  %p800_p8 = scmp.lt.s32.totalorder %s2828_s30, 5 }
  0x25   : > { %s3484_s8 = smov (%p53_p5, %s3482_s8), 0  ;;  %p3039_p9 = por %p654_p6, %p653_p4 }
  0x26   : > { %3428 = sst [smem:[#allocation16_spill]] %s3484_s8  ;;  %p801_p10 = pnand %p2375_p7, %p800_p8 }
  0x27   : > { %s3429_s1 = scalar_select %p3039_p9, 1, 0 }
  0x28   : > { %s634_s5 = ssub.s32 %s2824_s7, %s3484_s8  ;;  %s637_s26 = sadd.s32 1, %s2808_s6 }
  0x29   : > { %3430 = sst [smem:[#allocation17_spill]] %s3429_s1  ;;  %p635_p11 = scmp.eq.s32.totalorder %s634_s5, 0 }
  0x2a   : > { %804 = sbr.rel (%p801_p10) target bundleno = 3435 (0xd6b), region = 116  ;;  %p916_p12 = scmp.lt.s32.totalorder (!%p801_p10), %s2816_s29, 1 }
  0x2b   : > { %s3047_s9 = scalar_select %p635_p11, %s2808_s6, %s637_s26  }
  0x2c   : > { %p920_p13 = scmp.lt.s32.totalorder (!%p801_p10), %s2812_s2, 1  ;;  %s3432_s7 = sld [smem:[#allocation19_spill]] (!%p801_p10) }
  0x2d   : > { %3431 = sst [smem:[#allocation18_spill]] %s3047_s9 }
  0x2e   : > { %s3434_s12 = sld [smem:[#allocation29_spill]] (!%p801_p10) }
  0x2f   : > { %s917_s25 = scalar_select %p916_p12, %s2816_s29, 1 }
  0x30   : > { %s3054_s0 = scalar_select %p920_p13, %s2812_s2, 1 }
  0x31   : > { %s2376_s5 = sshll.u32 %s917_s25, 3  ;;  %s3435_s14 = sld [smem:[#allocation30_spill]] }
  0x32   : > { %s919_s3 = scalar_lea.vmem %s3432_s7, %s2376_s5  ;;  %s2437_s4 = sshll.u32 %s3054_s0, 4 }
  0x33   : > { %s3437_s18 = sld [smem:[#allocation32_spill]]  ;;  %s963_s27 = scalar_lea.vmem %s3381_s21, %s3054_s0 }
  0x34   : > { %s3071_s23 = scalar_lea.vmem %s3434_s12, %s2437_s4  ;;  %s3439_s12 = sld [smem:[#allocation34_spill]] }
  0x35   : > { %s3440_s17 = sld [smem:[#allocation35_spill]]  ;;  %s3441_s5 = sand.u32 1, %s2804_s28  }
  0x36   : > { %s3124_s7 = scalar_lea.vmem [#allocation4], %s3441_s5  ;;  %s3442_s19 = sld [smem:[#allocation9_spill]] }
  0x37   : > { %s3080_s6 = scalar_lea.vmem %s3435_s14, %s2437_s4  ;;  %s2440_s14 = sshll.u32 %s3054_s0, 5 }
  0x38   : > { %s3111_s1 = scalar_lea.vmem %s3380_s20, %s2440_s14 }
  0x39   : > { %s3097_s25 = scalar_lea.vmem %s3437_s18, %s2437_s4 }
  0x3a   : > { %s3116_s11 = scalar_lea.vmem %s3439_s12, %s2437_s4 }
  0x3b   : > { %s971_s8 = scalar_lea.vmem %s3440_s17, %s3054_s0 }
  0x3c   : > { %p2387_p0 = scmp.ne.s32.totalorder %s3442_s19, 0 }
  0x3d   : > { %s3443_s17 = sld [smem:[#allocation23_spill]] (!%p2387_p0) }
  0x3e   : > { %976 = sbr.rel (%p2387_p0) target bundleno = 578 (0x242), region = 120  ;;  %s3444_s9 = sld [smem:[#allocation21_spill]] (!%p2387_p0) }
  0x3f   : > { %s3445_s30 = sld [smem:[#allocation22_spill]] (!%p2387_p0) }
  0x40   : > { %s3446_s22 = sld [smem:[#allocation24_spill]] (!%p2387_p0) }
  0x41   : > { %s3447_s14 = sld [smem:[#allocation20_spill]] (!%p2387_p0) }
  0x43   : > { %v977_v1 = vld [vmem:[%s919_s3] sm:$0xff]  ;;  %vm980_vm0 = vcmask 261120   ;;  %v2689_v8 = vld [vmem:[%s3443_s17 + $0x8] sm:$0xff]   ;;  %v2830_v9 = vmov 0.0   ;;  %vm2831_vm1 = vmmov 0  }
  0x44   : > { %v981_v2 = vsel %vm980_vm0, %v977_v1, 0.0  ;;  %2483 = vmatprep.subr.bf16.mxu0 %v2830_v9  ;;  %2487 = vmatprep.mubr.msk.bf16.mxu0 %vm2831_vm1, %v2830_v9  ;;  %v2690_v10 = vld [vmem:[%s3443_s17] sm:$0xff]  }
  0x45   : > { %982 = vadd.xlane.f32.xlu0 %v981_v2  ;;  %2484 = vmatpush3.bf16.msra.mxu0 %v2689_v8  ;;  %v2388_v15 = vld [vmem:[%s3444_s9] ss:$0 sm:$0xff] }
  0x46   : > { %2485 = vmatprep.subr.bf16.mxu0 %v2830_v9  ;;  %v2389_v17 = vld [vmem:[%s3445_s30] ss:$0 sm:$0xff] }
  0x47   : > { %v2390_v21 = vld [vmem:[%s3446_s22] ss:$0 sm:$0xff] }
  0x48   : > { %v1077_v24 = vld [vmem:[%s3447_s14] sm:$0xff] }
  0x49   : > { %2486 = vmatpush3.bf16.msra.mxu0 %v2690_v10 }
  0xce   : > { %v983_v3 = vpop.xlane.xlu0 %982 }
  0xcf   : > { %v985_v4 = vmul.f32 0.03125, %v983_v3 }
  0xd1   : > { %v986_v5 = vsub.f32 %v977_v1, %v985_v4 }
  0xd3   : > { %v987_v6 = vmul.f32 %v986_v5, %v986_v5 }
  0xd5   : > { %v988_v7 = vsel %vm980_vm0, %v987_v6, 0.0 }
  0xd6   : > { %989 = vadd.xlane.f32.xlu0 %v988_v7 }
 0x15f   : > { %v990_v11 = vpop.xlane.xlu0 %989 }
 0x160   : > { %v991_v12 = vmul.f32 0.03125, %v990_v11 }
 0x162   : > { %v992_v13 = vadd.f32 1e-05, %v991_v12 }
 0x164   : > { %2691 = vrsqrt.f32 %v992_v13 }
 0x171   : > { %v2692_v14 = vpop.eup %2691 }
 0x172   : > { %v994_v16 = vmul.f32 %v2692_v14, %v986_v5 }
 0x174   : > { %v1001_v18 = vmul.f32 %v2388_v15, %v994_v16 }
 0x176   : > { %v1008_v19 = vadd.f32 %v2389_v17, %v1001_v18 }
 0x178   : > { %v1009_v20 = vpack.c.bf16 %v1008_v19, %v1008_v19 }
 0x17a   : > { %2488 = vmatmul.mubr.msk.bf16.vlgmr.msra.gmra.mxu0 %vm980_vm0, %v1009_v20 }
 0x23a   : > { %v1070_v22 = vpop.f32.mrf.mxu0 }
 0x23b   : > { %v1071_v23 = vadd.f32 %v2390_v21, %v1070_v22 }
 0x23c   : > { %v2489_v25 = vpop.f32.mrf.mxu0 }
 0x23d   : > { %v1076_v26 = vmax.f32 %v1071_v23, 0.0 }
 0x23e   : > { %v1073_v27 = vpop.f32.mrf.mxu0 }
 0x23f   : > { %v1078_v28 = vadd.f32 %v1077_v24, %v1076_v26 }
 0x240   : > { %v2490_v29 = vpop.f32.mrf.mxu0 }
 0x241   : > { %1079 = vst.msk [vmem:[#allocation2] sm:$0xff] %vm980_vm0, %v1078_v28 }
 0x242 PF: > { %vm1083_vm2 = vcmask 261120   ;;  %v2693_v37 = vld [vmem:[%s3071_s23 + $0x8] sm:$0xff]   ;;  %v2832_v38 = vmov 0.0   ;;  %vm2833_vm3 = vmmov 0   ;;  %v2694_v39 = vld [vmem:[%s3071_s23] sm:$0xff]   ;;  %s3448_s23 = scalar_lea.vmem %s3370_s10, %s3054_s0  ;;  %s3449_s9 = sld [smem:[#allocation28_spill]] }
 0x243   : > { %2491 = vmatprep.subr.bf16.mxu0 %v2832_v38  ;;  %2495 = vmatprep.mubr.msk.bf16.mxu0 %vm2833_vm3, %v2832_v38  ;;  %v2394_v44 = vld [vmem:[%s3448_s23] ss:$0 sm:$0xff]  ;;  %s3451_s2 = scalar_lea.vmem %s3373_s13, %s3054_s0  ;;  %s2834_s29 = smov 120   ;;  %vm1183_vm4 = vcmask 64512   ;;  %vm1256_vm5 = vcmask 1043456   ;;  %vm1673_vm6 = vcmask 130048  }
 0x244   : > { %2492 = vmatpush3.bf16.msra.mxu0 %v2693_v37  ;;  %2499 = vmatprep.subr.bf16.mxu1 %v2832_v38  ;;  %v2396_v50 = vld [vmem:[%s3451_s2] ss:$0 sm:$0xff]  ;;  %s2835_s22 = smov 96   ;;  %s2836_s5 = smov 48   ;;  %vm1676_vm7 = vcmask 195584   ;;  %vm1890_vm8 = vcmask 523264  }
 0x245   : > { %2493 = vmatprep.subr.bf16.mxu0 %v2832_v38  ;;  %2501 = vmatprep.mubr.msk.bf16.mxu1 %vm2833_vm3, %v2832_v38  ;;  %s2837_s12 = smov 88   ;;  %s2838_s14 = smov 80  }
 0x246   : > { %s2839_s18 = smov 112   ;;  %s2840_s19 = smov 72  }
 0x247   : > { %s2841_s23 = smov 104   ;;  %s2842_s4 = smov 64  }
 0x248   : > { %v3149_v30 = vld [vmem:[#allocation2] sm:$0xff]  ;;  %2494 = vmatpush3.bf16.msra.mxu0 %v2694_v39  ;;  %s3450_s26 = scalar_lea.vmem %s3449_s9, %s3054_s0  ;;  %s2843_s3 = smov 56  }
 0x249   : > { %v1084_v31 = vsel %vm1083_vm2, %v3149_v30, 0.0  ;;  %2505 = vmatprep.subr.bf16.mxu0 %v2832_v38  ;;  %v2395_v46 = vld [vmem:[%s3450_s26] ss:$0 sm:$0xff]  ;;  %s2844_s9 = smov 40   ;;  %s2845_s26 = smov 8  }
 0x24a   : > { %1085 = vadd.xlane.f32.xlu0 %v1084_v31  ;;  %s2846_s24 = smov 16  }
 0x2d3   : > { %v1086_v32 = vpop.xlane.xlu0 %1085 }
 0x2d4   : > { %v1088_v33 = vmul.f32 0.03125, %v1086_v32 }
 0x2d6   : > { %v1089_v34 = vsub.f32 %v3149_v30, %v1088_v33 }
 0x2d8   : > { %v1090_v35 = vmul.f32 %v1089_v34, %v1089_v34 }
 0x2da   : > { %v1091_v36 = vsel %vm1083_vm2, %v1090_v35, 0.0 }
 0x2db   : > { %1092 = vadd.xlane.f32.xlu0 %v1091_v36 }
 0x364   : > { %v1093_v40 = vpop.xlane.xlu0 %1092 }
 0x365   : > { %v1094_v41 = vmul.f32 0.03125, %v1093_v40 }
 0x367   : > { %v1095_v42 = vadd.f32 1e-05, %v1094_v41 }
 0x369   : > { %2705 = vrsqrt.f32 %v1095_v42 }
 0x376   : > { %v2706_v43 = vpop.eup %2705 }
 0x377   : > { %v1097_v45 = vmul.f32 %v2706_v43, %v1089_v34 }
 0x379   : > { %v1104_v47 = vmul.f32 %v2394_v44, %v1097_v45 }
 0x37b   : > { %v1111_v48 = vadd.f32 %v2395_v46, %v1104_v47 }
 0x37d   : > { %v1112_v49 = vpack.c.bf16 %v1111_v48, %v1111_v48 }
 0x37f   : > { %2496 = vmatmul.mubr.msk.bf16.vlgmr.msra.gmra.mxu0 %vm1083_vm2, %v1112_v49 }
 0x380   : > { %2507 = vmatprep.mubr.msk.bf16.mxu0 %vm2833_vm3, %v2832_v38 }
 0x43f   : > { %v1173_v51 = vpop.f32.mrf.mxu0 }
 0x440   : > { %v1174_v52 = vadd.f32 %v2396_v50, %v1173_v51 }
 0x441   : > { %v2497_v53 = vpop.f32.mrf.mxu0 }
 0x442   : > { %v1179_v54 = vpack.c.bf16 %v1174_v52, %v1174_v52 }
 0x443   : > { %v1176_v55 = vpop.f32.mrf.mxu0 }
 0x444   : > { %1301 = vrot.lane.b32.xlu0 %v1179_v54, %s2834_s29  ;;  %1181 = vrot.lane.b32.xlu1 %v1179_v54, %s2835_s22  ;;  %s3452_s29 = scalar_lea.vmem %s3375_s15, %s3054_s0 }
 0x445   : > { %v2498_v56 = vpop.f32.mrf.mxu0 }
 0x448   : > { %1492 = vrot.lane.b32.xlu0 %v1179_v54, %s2836_s5  ;;  %1303 = vrot.lane.b32.xlu1 %v1179_v54, %s2837_s12  ;;  %s3453_s12 = scalar_lea.vmem %s3376_s16, %s3054_s0 }
 0x44c   : > { %1423 = vrot.lane.b32.xlu1 %v1179_v54, %s2838_s14 }
 0x450   : > { %1421 = vrot.lane.b32.xlu1 %v1179_v54, %s2839_s18  ;;  %s3454_s18 = sld [smem:[#allocation31_spill]] }
 0x454   : > { %1543 = vrot.lane.b32.xlu1 %v1179_v54, %s2840_s19 }
 0x456   : > { %s3455_s19 = scalar_lea.vmem %s3454_s18, %s3054_s0 }
 0x458   : > { %1541 = vrot.lane.b32.xlu1 %v1179_v54, %s2841_s23 }
 0x45c   : > { %1251 = vrot.lane.b32.xlu1 %v1179_v54, %s2842_s4 }
 0x460   : > { %1372 = vrot.lane.b32.xlu1 %v1179_v54, %s2843_s3  ;;  %s3456_s3 = sld [smem:[#allocation33_spill]] }
 0x464   : > { %1612 = vrot.lane.b32.xlu1 %v1179_v54, %s2844_s9 }
 0x466   : > { %s3457_s9 = scalar_lea.vmem %s3456_s3, %s3054_s0 }
 0x4b6   : > { %v1182_v57 = vpop.permute.xlu1 %1181  ;;  %v1302_v63 = vpop.permute.xlu0 %1301 }
 0x4b7   : > { %v1188_v58 = vsel %vm1183_vm4, %v1182_v57, 0 }
 0x4b8   : > { %2500 = vmatpush3.bf16.xpose.msra.mxu1 %v1188_v58 }
 0x4b9   : > { %2511 = vmatprep.subr.bf16.mxu1 %v2832_v38 }
 0x4ba   : > { %v1304_v59 = vpop.permute.xlu1 %1303 }
 0x4bb   : > { %v1309_v61 = vsel %vm1183_vm4, %v1304_v59, 0 }
 0x4be   : > { %v1424_v60 = vpop.permute.xlu1 %1423 }
 0x4bf   : > { %2502 = vmatmul.mubr.msk.bf16.vlgmr.msra.gmra.mxu1 %vm1183_vm4, %v1179_v54  ;;  %v1429_v1 = vsel %vm1183_vm4, %v1424_v60, 0 }
 0x4c0   : > { %2512 = vmatpush3.bf16.xpose.msra.mxu1 %v1309_v61  ;;  %2513 = vmatprep.mubr.msk.bf16.mxu1 %vm2833_vm3, %v2832_v38 }
 0x4c1   : > { %2523 = vmatprep.subr.bf16.mxu1 %v2832_v38 }
 0x4c2   : > { %v1422_v62 = vpop.permute.xlu1 %1421 }
 0x4c6   : > { %v1544_v0 = vpop.permute.xlu1 %1543 }
 0x4c7   : > { %2514 = vmatmul.mubr.msk.bf16.vlgmr.msra.gmra.mxu1 %vm1183_vm4, %v1302_v63  ;;  %v1549_v4 = vsel %vm1183_vm4, %v1544_v0, 0 }
 0x4c8   : > { %2524 = vmatpush3.bf16.xpose.msra.mxu1 %v1429_v1  ;;  %2525 = vmatprep.mubr.msk.bf16.mxu1 %vm2833_vm3, %v2832_v38 }
 0x4c9   : > { %2535 = vmatprep.subr.bf16.mxu1 %v2832_v38 }
 0x4ca   : > { %v1542_v2 = vpop.permute.xlu1 %1541 }
 0x4ce   : > { %v1252_v3 = vpop.permute.xlu1 %1251 }
 0x4cf   : > { %v1258_v5 = vsel %vm1256_vm5, %v1252_v3, 0  ;;  %2526 = vmatmul.mubr.msk.bf16.vlgmr.msra.gmra.mxu1 %vm1183_vm4, %v1422_v62 }
 0x4d0   : > { %2506 = vmatpush3.bf16.msra.mxu0 %v1258_v5  ;;  %2536 = vmatpush3.bf16.xpose.msra.mxu1 %v1549_v4 }
 0x4d1   : > { %2537 = vmatprep.mubr.msk.bf16.mxu1 %vm2833_vm3, %v2832_v38  ;;  %2517 = vmatprep.subr.bf16.mxu0 %v2832_v38 }
 0x4d2   : > { %2547 = vmatprep.subr.bf16.mxu1 %v2832_v38 }
 0x4d7   : > { %2538 = vmatmul.mubr.msk.bf16.vlgmr.msra.gmra.mxu1 %vm1183_vm4, %v1542_v2 }
 0x4d8   : > { %2551 = vmatprep.mubr.msk.bf16.mxu1 %vm2833_vm3, %v2832_v38 }
 0x57f   : > { %v1224_v6 = vpop.f32.mrf.mxu1 }
 0x580   : > { %v1230_v7 = vmul.f32 0.35355338, %v1224_v6 }
 0x581   : > { %v2503_v8 = vpop.f32.mrf.mxu1 }
 0x582   : > { %v1231_v9 = vsel %vm1183_vm4, %v1230_v7, -inf }
 0x583   : > { %v1232_v10 = vrot.slane %v1231_v9, 4  ;;  %v1227_v11 = vpop.f32.mrf.mxu1 }
 0x585   : > { %v1233_v12 = vmax.f32 %v1231_v9, %v1232_v10  ;;  %v2504_v13 = vpop.f32.mrf.mxu1 }
 0x587   : > { %v1234_v14 = vrot.slane %v1233_v12, 2  ;;  %v1345_v15 = vpop.f32.mrf.mxu1 }
 0x588   : > { %v1351_v16 = vmul.f32 0.35355338, %v1345_v15 }
 0x589   : > { %v1235_v17 = vmax.f32 %v1233_v12, %v1234_v14  ;;  %v2515_v18 = vpop.f32.mrf.mxu1 }
 0x58a   : > { %v1352_v19 = vsel %vm1183_vm4, %v1351_v16, -inf }
 0x58b   : > { %v1236_v20 = vrot.slane %v1235_v17, 1  ;;  %v1353_v21 = vrot.slane %v1352_v19, 4  ;;  %v1348_v22 = vpop.f32.mrf.mxu1 }
 0x58d   : > { %v1237_v23 = vmax.f32 %v1235_v17, %v1236_v20  ;;  %v1354_v24 = vmax.f32 %v1352_v19, %v1353_v21  ;;  %v2516_v25 = vpop.f32.mrf.mxu1 }
 0x58f   : > { %v1238_v26 = vsub.f32 %v1230_v7, %v1237_v23  ;;  %v1355_v27 = vrot.slane %v1354_v24, 2  ;;  %v1465_v28 = vpop.f32.mrf.mxu1 }
 0x590   : > { %v1471_v29 = vmul.f32 0.35355338, %v1465_v28 }
 0x591   : > { %v1239_v31 = vmul.f32 1.442695, %v1238_v26  ;;  %v1356_v32 = vmax.f32 %v1354_v24, %v1355_v27  ;;  %v2527_v33 = vpop.f32.mrf.mxu1 }
 0x592   : > { %v1472_v34 = vsel %vm1183_vm4, %v1471_v29, -inf }
 0x593   : > { %2707 = vpow2.f32 %v1239_v31  ;;  %v1357_v35 = vrot.slane %v1356_v32, 1  ;;  %v1473_v36 = vrot.slane %v1472_v34, 4  ;;  %v1468_v37 = vpop.f32.mrf.mxu1  ;;  %v1373_v31 = vpop.permute.xlu1 %1372 }
 0x595   : > { %v1358_v39 = vmax.f32 %v1356_v32, %v1357_v35  ;;  %v1474_v40 = vmax.f32 %v1472_v34, %v1473_v36  ;;  %v2528_v41 = vpop.f32.mrf.mxu1  ;;  %v1378_v34 = vsel %vm1256_vm5, %v1373_v31, 0 }
 0x596   : > { %v1493_v41 = vpop.permute.xlu0 %1492 }
 0x597   : > { %v1359_v42 = vsub.f32 %v1351_v16, %v1358_v39  ;;  %v1475_v43 = vrot.slane %v1474_v40, 2  ;;  %v1585_v44 = vpop.f32.mrf.mxu1 }
 0x598   : > { %v1591_v45 = vmul.f32 0.35355338, %v1585_v44 }
 0x599   : > { %v1360_v46 = vmul.f32 1.442695, %v1359_v42  ;;  %v1476_v47 = vmax.f32 %v1474_v40, %v1475_v43  ;;  %v2539_v48 = vpop.f32.mrf.mxu1  ;;  %v1498_v43 = vsel %vm1256_vm5, %v1493_v41, 0 }
 0x59a   : > { %v1592_v49 = vsel %vm1183_vm4, %v1591_v45, -inf }
 0x59b   : > { %2709 = vpow2.f32 %v1360_v46  ;;  %v1477_v50 = vrot.slane %v1476_v47, 1  ;;  %v1593_v51 = vrot.slane %v1592_v49, 4  ;;  %v1588_v52 = vpop.f32.mrf.mxu1  ;;  %v1613_v46 = vpop.permute.xlu1 %1612 }
 0x59c   : > { %v1618_v48 = vsel %vm1256_vm5, %v1613_v46, 0  ;;  %v2414_v46 = vld [vmem:[%s3457_s9] ss:$0 sm:$0xff] }
 0x59d   : > { %v1478_v53 = vmax.f32 %v1476_v47, %v1477_v50  ;;  %v1594_v54 = vmax.f32 %v1592_v49, %v1593_v51  ;;  %v2540_v55 = vpop.f32.mrf.mxu1 }
 0x59f   : > { %v1479_v56 = vsub.f32 %v1471_v29, %v1478_v53  ;;  %v1595_v57 = vrot.slane %v1594_v54, 2 }
 0x5a0   : > { %v2708_v58 = vpop.eup %2707 }
 0x5a1   : > { %v1241_v59 = vsel %vm1183_vm4, %v2708_v58, 0.0  ;;  %v1480_v60 = vmul.f32 1.442695, %v1479_v56  ;;  %v1596_v61 = vmax.f32 %v1594_v54, %v1595_v57  ;;  %v2695_v56 = vld [vmem:[%s3080_s6 + $0x8] sm:$0xff]  }
 0x5a2   : > { %v1242_v62 = vrot.slane %v1241_v59, 4  ;;  %2548 = vmatpush3.bf16.msra.mxu1 %v2695_v56 }
 0x5a3   : > { %2711 = vpow2.f32 %v1480_v60  ;;  %v1597_v63 = vrot.slane %v1596_v61, 1  ;;  %2549 = vmatprep.subr.bf16.mxu1 %v2832_v38 }
 0x5a4   : > { %v1243_v0 = vadd.f32 %v1242_v62, %v1241_v59 }
 0x5a5   : > { %v1598_v1 = vmax.f32 %v1596_v61, %v1597_v63 }
 0x5a6   : > { %v1244_v2 = vrot.slane %v1243_v0, 2 }
 0x5a7   : > { %v1599_v3 = vsub.f32 %v1591_v45, %v1598_v1 }
 0x5a8   : > { %v2710_v4 = vpop.eup %2709  ;;  %v1245_v5 = vadd.f32 %v1244_v2, %v1243_v0 }
 0x5a9   : > { %v1362_v6 = vsel %vm1183_vm4, %v2710_v4, 0.0  ;;  %v1600_v7 = vmul.f32 1.442695, %v1599_v3 }
 0x5aa   : > { %v1246_v8 = vrot.slane %v1245_v5, 1  ;;  %v1363_v9 = vrot.slane %v1362_v6, 4 }
 0x5ab   : > { %2713 = vpow2.f32 %v1600_v7 }
 0x5ac   : > { %v1247_v10 = vadd.f32 %v1246_v8, %v1245_v5  ;;  %v1364_v11 = vadd.f32 %v1363_v9, %v1362_v6 }
 0x5ae   : > { %2715 = vrcp.f32 %v1247_v10  ;;  %v1365_v12 = vrot.slane %v1364_v11, 2 }
 0x5b0   : > { %v2712_v13 = vpop.eup %2711  ;;  %v1366_v14 = vadd.f32 %v1365_v12, %v1364_v11 }
 0x5b1   : > { %v1482_v15 = vsel %vm1183_vm4, %v2712_v13, 0.0 }
 0x5b2   : > { %v1367_v16 = vrot.slane %v1366_v14, 1  ;;  %v1483_v17 = vrot.slane %v1482_v15, 4 }
 0x5b4   : > { %v1368_v18 = vadd.f32 %v1367_v16, %v1366_v14  ;;  %v1484_v19 = vadd.f32 %v1483_v17, %v1482_v15  ;;  %v2408_v16 = vld [vmem:[%s3452_s29] ss:$0 sm:$0xff] }
 0x5b6   : > { %2717 = vrcp.f32 %v1368_v18  ;;  %v1485_v20 = vrot.slane %v1484_v19, 2 }
 0x5b8   : > { %v2714_v21 = vpop.eup %2713  ;;  %v1486_v22 = vadd.f32 %v1485_v20, %v1484_v19 }
 0x5b9   : > { %v1602_v23 = vsel %vm1183_vm4, %v2714_v21, 0.0 }
 0x5ba   : > { %v1487_v24 = vrot.slane %v1486_v22, 1  ;;  %v1603_v25 = vrot.slane %v1602_v23, 4 }
 0x5bb   : > { %v2716_v26 = vpop.eup %2715 }
 0x5bc   : > { %v1488_v27 = vadd.f32 %v1487_v24, %v1486_v22  ;;  %v1604_v28 = vadd.f32 %v1603_v25, %v1602_v23  ;;  %v1249_v29 = vmul.f32 %v2716_v26, %v2708_v58  ;;  %v2696_v58 = vld [vmem:[%s3080_s6] sm:$0xff]   ;;  %s2847_s6 = smov 24  }
 0x5bd   : > { %2550 = vmatpush3.bf16.msra.mxu1 %v2696_v58 }
 0x5be   : > { %2719 = vrcp.f32 %v1488_v27  ;;  %v1605_v32 = vrot.slane %v1604_v28, 2  ;;  %v1250_v33 = vpack.c.bf16 %v1249_v29, %v1249_v29  ;;  %2563 = vmatprep.subr.bf16.mxu1 %v2832_v38  ;;  %v2697_v29 = vld [vmem:[%s3097_s25 + $0x8] sm:$0xff]  }
 0x5c0   : > { %v1606_v35 = vadd.f32 %v1605_v32, %v1604_v28  ;;  %2508 = vmatmul.mubr.msk.bf16.vlgmr.msra.gmra.mxu0 %vm1183_vm4, %v1250_v33 }
 0x5c1   : > { %2518 = vmatpush3.bf16.msra.mxu0 %v1378_v34  ;;  %2519 = vmatprep.mubr.msk.bf16.mxu0 %vm2833_vm3, %v2832_v38 }
 0x5c2   : > { %v1607_v36 = vrot.slane %v1606_v35, 1  ;;  %2529 = vmatprep.subr.bf16.mxu0 %v2832_v38 }
 0x5c3   : > { %v2718_v37 = vpop.eup %2717 }
 0x5c4   : > { %v1608_v39 = vadd.f32 %v1607_v36, %v1606_v35  ;;  %v1370_v40 = vmul.f32 %v2718_v37, %v2710_v4  ;;  %v2412_v35 = vld [vmem:[%s3453_s12] ss:$0 sm:$0xff] }
 0x5c5   : > { %v2413_v37 = vld [vmem:[%s3455_s19] ss:$0 sm:$0xff] }
 0x5c6   : > { %2721 = vrcp.f32 %v1608_v39  ;;  %v1371_v42 = vpack.c.bf16 %v1370_v40, %v1370_v40 }
 0x5c8   : > { %2520 = vmatmul.mubr.msk.bf16.vlgmr.msra.gmra.mxu0 %vm1183_vm4, %v1371_v42  ;;  %v2699_v42 = vld [vmem:[%s3111_s1 + $0x18] sm:$0xff]  }
 0x5c9   : > { %2530 = vmatpush3.bf16.msra.mxu0 %v1498_v43  ;;  %2531 = vmatprep.mubr.msk.bf16.mxu0 %vm2833_vm3, %v2832_v38  ;;  %v2700_v43 = vld [vmem:[%s3111_s1 + $0x10] sm:$0xff]  }
 0x5ca   : > { %2541 = vmatprep.subr.bf16.mxu0 %v2832_v38 }
 0x5cb   : > { %v2720_v44 = vpop.eup %2719 }
 0x5cc   : > { %v1490_v45 = vmul.f32 %v2720_v44, %v2712_v13  ;;  %v2701_v44 = vld [vmem:[%s3111_s1 + $0x8] sm:$0xff]  }
 0x5ce   : > { %v1491_v47 = vpack.c.bf16 %v1490_v45, %v1490_v45  ;;  %v2702_v45 = vld [vmem:[%s3111_s1] sm:$0xff]  }
 0x5d0   : > { %2532 = vmatmul.mubr.msk.bf16.vlgmr.msra.gmra.mxu0 %vm1183_vm4, %v1491_v47 }
 0x5d1   : > { %2542 = vmatpush3.bf16.msra.mxu0 %v1618_v48  ;;  %2543 = vmatprep.mubr.msk.bf16.mxu0 %vm2833_vm3, %v2832_v38 }
 0x5d2   : > { %2555 = vmatprep.subr.bf16.mxu0 %v2832_v38 }
 0x5d3   : > { %v2722_v49 = vpop.eup %2721 }
 0x5d4   : > { %v1610_v50 = vmul.f32 %v2722_v49, %v2714_v21 }
 0x5d6   : > { %v1611_v51 = vpack.c.bf16 %v1610_v50, %v1610_v50 }
 0x5d8   : > { %2544 = vmatmul.mubr.msk.bf16.vlgmr.msra.gmra.mxu0 %vm1183_vm4, %v1611_v51 }
 0x5d9   : > { %2559 = vmatprep.mubr.msk.bf16.mxu0 %vm2833_vm3, %v2832_v38  ;;  %2556 = vmatpush3.bf16.msra.mxu0 %v2697_v29 }
 0x5da   : > { %2557 = vmatprep.subr.bf16.mxu0 %v2832_v38 }
 0x680   : > { %v1294_v52 = vpop.f32.mrf.mxu0 }
 0x681   : > { %v1300_v10 = vpack.c.bf16 %v1294_v52, %v1294_v52 }
 0x682   : > { %v2509_v53 = vpop.f32.mrf.mxu0 }
 0x684   : > { %v1297_v54 = vpop.f32.mrf.mxu0 }
 0x686   : > { %v2510_v55 = vpop.f32.mrf.mxu0 }
 0x688   : > { %v1414_v57 = vpop.f32.mrf.mxu0 }
 0x689   : > { %v1420_v59 = vpack.c.bf16 %v1414_v57, %v1414_v57 }
 0x68a   : > { %v2521_v60 = vpop.f32.mrf.mxu0 }
 0x68b   : > { %1662 = vrot.lane.b32.xlu0 %v1420_v59, %s2845_s26 }
 0x68c   : > { %v1417_v61 = vpop.f32.mrf.mxu0 }
 0x68e   : > { %v2522_v62 = vpop.f32.mrf.mxu0 }
 0x68f   : > { %v2703_v62 = vld [vmem:[%s3116_s11 + $0x8] sm:$0xff]  }
 0x690   : > { %v1534_v63 = vpop.f32.mrf.mxu0 }
 0x691   : > { %v1540_v0 = vpack.c.bf16 %v1534_v63, %v1534_v63  ;;  %v2704_v63 = vld [vmem:[%s3116_s11] sm:$0xff]  }
 0x692   : > { %v2533_v1 = vpop.f32.mrf.mxu0 }
 0x693   : > { %1665 = vrot.lane.b32.xlu1 %v1540_v0, %s2846_s24  ;;  %v2418_v0 = vld [vmem:[%s963_s27] ss:$0 sm:$0xff]  ;;  %s3459_s27 = sld [smem:[#allocation9_spill]] }
 0x694   : > { %v1537_v2 = vpop.f32.mrf.mxu0 }
 0x696   : > { %v2534_v3 = vpop.f32.mrf.mxu0 }
 0x698   : > { %v1654_v4 = vpop.f32.mrf.mxu0 }
 0x699   : > { %v1660_v5 = vpack.c.bf16 %v1654_v4, %v1654_v4  ;;  %p2428_p1 = scmp.ne.s32.totalorder %s3459_s27, 1 }
 0x69a   : > { %v2545_v6 = vpop.f32.mrf.mxu0  ;;  %s3460_s29 = sld [smem:[#allocation25_spill]] (!%p2428_p1) }
 0x69b   : > { %1668 = vrot.lane.b32.xlu0 %v1660_v5, %s2847_s6  ;;  %s3463_s19 = sld [smem:[#allocation27_spill]] (!%p2428_p1) }
 0x69c   : > { %v1657_v7 = vpop.f32.mrf.mxu0 }
 0x69e   : > { %v2546_v8 = vpop.f32.mrf.mxu0 }
 0x6a0   : > { %s3461_s22 = smov (!%p2428_p1), %s3460_s29 }
 0x6fd   : > { %v1663_v9 = vpop.permute.xlu0 %1662 }
 0x6fe   : > { %v1672_v12 = vsel %vm1183_vm4, %v1300_v10, %v1663_v9 }
 0x705   : > { %v1666_v11 = vpop.permute.xlu1 %1665 }
 0x706   : > { %v1675_v13 = vsel %vm1673_vm6, %v1672_v12, %v1666_v11 }
 0x70d   : > { %v1669_v14 = vpop.permute.xlu0 %1668 }
 0x70e   : > { %v1678_v15 = vsel %vm1676_vm7, %v1675_v13, %v1669_v14 }
 0x70f   : > { %2552 = vmatmul.mubr.msk.bf16.vlgmr.msra.gmra.mxu1 %vm1083_vm2, %v1678_v15 }
 0x710   : > { %2571 = vmatprep.mubr.msk.bf16.mxu1 %vm2833_vm3, %v2832_v38  ;;  %2564 = vmatpush3.bf16.msra.mxu1 %v2699_v42 }
 0x711   : > { %2565 = vmatprep.subr.bf16.mxu1 %v2832_v38 }
 0x714   : > { %2566 = vmatpush3.bf16.msra.mxu1 %v2700_v43 }
 0x715   : > { %2567 = vmatprep.subr.bf16.mxu1 %v2832_v38 }
 0x718   : > { %2568 = vmatpush3.bf16.msra.mxu1 %v2701_v44 }
 0x719   : > { %2569 = vmatprep.subr.bf16.mxu1 %v2832_v38 }
 0x71c   : > { %2570 = vmatpush3.bf16.msra.mxu1 %v2702_v45 }
 0x7cf   : > { %v1738_v17 = vpop.f32.mrf.mxu1 }
 0x7d0   : > { %v1739_v18 = vadd.f32 %v2408_v16, %v1738_v17 }
 0x7d1   : > { %v2553_v19 = vpop.f32.mrf.mxu1 }
 0x7d2   : > { %v3245_v20 = vadd.f32 %v1739_v18, %v3149_v30  ;;  %v2698_v30 = vld [vmem:[%s3097_s25] sm:$0xff]   ;;  %s3462_s25 = sld [smem:[#allocation26_spill]] (!%p2428_p1) }
 0x7d3   : > { %v1741_v21 = vpop.f32.mrf.mxu1  ;;  %2558 = vmatpush3.bf16.msra.mxu0 %v2698_v30 }
 0x7d4   : > { %v1747_v22 = vsel %vm1083_vm2, %v3245_v20, 0.0  ;;  %2575 = vmatprep.subr.bf16.mxu0 %v2832_v38 }
 0x7d5   : > { %1748 = vadd.xlane.f32.xlu1 %v1747_v22  ;;  %v2554_v23 = vpop.f32.mrf.mxu1 }
 0x85e   : > { %v1749_v24 = vpop.xlane.xlu1 %1748 }
 0x85f   : > { %v1750_v25 = vmul.f32 0.03125, %v1749_v24 }
 0x861   : > { %v1751_v26 = vsub.f32 %v3245_v20, %v1750_v25 }
 0x863   : > { %v1752_v27 = vmul.f32 %v1751_v26, %v1751_v26 }
 0x865   : > { %v1753_v28 = vsel %vm1083_vm2, %v1752_v27, 0.0 }
 0x866   : > { %1754 = vadd.xlane.f32.xlu0 %v1753_v28 }
 0x8ef   : > { %v1755_v31 = vpop.xlane.xlu0 %1754 }
 0x8f0   : > { %v1756_v32 = vmul.f32 0.03125, %v1755_v31 }
 0x8f2   : > { %v1757_v33 = vadd.f32 1e-05, %v1756_v32 }
 0x8f4   : > { %2723 = vrsqrt.f32 %v1757_v33 }
 0x901   : > { %v2724_v34 = vpop.eup %2723 }
 0x902   : > { %v1759_v36 = vmul.f32 %v2724_v34, %v1751_v26 }
 0x904   : > { %v1766_v39 = vmul.f32 %v2412_v35, %v1759_v36 }
 0x906   : > { %v1773_v40 = vadd.f32 %v2413_v37, %v1766_v39 }
 0x908   : > { %v1774_v41 = vpack.c.bf16 %v1773_v40, %v1773_v40 }
 0x90a   : > { %2560 = vmatmul.mubr.msk.bf16.vlgmr.msra.gmra.mxu0 %vm1083_vm2, %v1774_v41 }
 0x90b   : > { %2579 = vmatprep.mubr.msk.bf16.mxu0 %vm2833_vm3, %v2832_v38  ;;  %2576 = vmatpush3.bf16.msra.mxu0 %v2703_v62 }
 0x90c   : > { %2577 = vmatprep.subr.bf16.mxu0 %v2832_v38  ;;  %v2424_v38 = vld [vmem:[%s971_s8] ss:$0 sm:$0xff] }
 0x90f   : > { %2578 = vmatpush3.bf16.msra.mxu0 %v2704_v63 }
 0x9ca   : > { %v1835_v47 = vpop.f32.mrf.mxu0 }
 0x9cb   : > { %v1836_v48 = vadd.f32 %v2414_v46, %v1835_v47 }
 0x9cc   : > { %v2561_v49 = vpop.f32.mrf.mxu0 }
 0x9cd   : > { %v1842_v50 = vmul.f32 0.044715, %v1836_v48  ;;  %v1841_v58 = vmul.f32 0.5, %v1836_v48 }
 0x9ce   : > { %v1838_v51 = vpop.f32.mrf.mxu0 }
 0x9cf   : > { %v1843_v52 = vmul.f32 %v1842_v50, %v1836_v48 }
 0x9d0   : > { %v2562_v53 = vpop.f32.mrf.mxu0 }
 0x9d1   : > { %v1844_v54 = vmul.f32 %v1843_v52, %v1836_v48 }
 0x9d3   : > { %v1845_v55 = vadd.f32 %v1844_v54, %v1836_v48 }
 0x9d5   : > { %v1846_v56 = vmul.f32 0.7978846, %v1845_v55 }
 0x9d7   : > { %2725 = vtanh.f32 %v1846_v56 }
 0x9e4   : > { %v2726_v57 = vpop.eup %2725 }
 0x9e5   : > { %v1848_v59 = vadd.f32 1.0, %v2726_v57 }
 0x9e7   : > { %v1849_v60 = vmul.f32 %v1848_v59, %v1841_v58 }
 0x9e9   : > { %v1850_v61 = vpack.c.bf16 %v1849_v60, %v1849_v60 }
 0x9eb   : > { %2572 = vmatmul.mubr.msk.bf16.vlgmr.msra.gmra.mxu1 %vm1890_vm8, %v1850_v61 }
 0xaab   : > { %v1928_v1 = vpop.f32.mrf.mxu1 }
 0xaac   : > { %v1929_v2 = vadd.f32 %v2418_v0, %v1928_v1 }
 0xaad   : > { %v2573_v3 = vpop.f32.mrf.mxu1 }
 0xaae   : > { %v1934_v4 = vadd.f32 %v1929_v2, %v3245_v20 }
 0xaaf   : > { %v1931_v5 = vpop.f32.mrf.mxu1 }
 0xab0   : > { %v1935_v6 = vpack.c.bf16 %v1934_v4, %v1934_v4 }
 0xab1   : > { %v2574_v7 = vpop.f32.mrf.mxu1 }
 0xab2   : > { %2580 = vmatmul.mubr.msk.bf16.vlgmr.msra.gmra.mxu0 %vm1083_vm2, %v1935_v6 }
 0xb72   : > { %v1996_v8 = vpop.f32.mrf.mxu0 }
 0xb73   : > { %v1997_v9 = vadd.f32 %v2424_v38, %v1996_v8 }
 0xb74   : > { %v2581_v10 = vpop.f32.mrf.mxu0  ;;  %2006 = sbr.rel (%p2428_p1) target bundleno = 3409 (0xd51), region = 124 }
 0xb75   : > { %2002 = vst.msk [vmem:[#allocation2] sm:$0xff] %vm1083_vm2, %v1997_v9 }
 0xb76   : > { %v1999_v11 = vpop.f32.mrf.mxu0 }
 0xb78   : > { %v2582_v12 = vpop.f32.mrf.mxu0 }
 0xb79   : > { %v2728_v13 = vld [vmem:[%s3460_s29 + $0x8] sm:$0xff]   ;;  %v2848_v14 = vmov 0.0   ;;  %v2729_v15 = vld [vmem:[%s3461_s22] sm:$0xff]   ;;  %vm2849_vm9 = vmmov 0   ;;  %v2850_v19 = vmov 0   ;;  %v2138_v39 = vlaneseq }
 0xb7a   : > { %2583 = vmatprep.subr.bf16.mxu0 %v2848_v14  ;;  %2591 = vmatprep.subr.bf16.mxu1 %v2848_v14  ;;  %v2132_v18 = vld [vmem:[#allocation3] sm:$0x1]  ;;  %v2429_v20 = vld [vmem:[%s3462_s25] ss:$0 sm:$0xff]  ;;  %vm2149_vm10 = vcmask 57344  }
 0xb7b   : > { %2584 = vmatpush3.bf16.msra.mxu0 %v2728_v13  ;;  %2587 = vmatprep.mubr.msk.bf16.mxu0 %vm2849_vm9, %v2848_v14  ;;  %v2084_v37 = vld [vmem:[%s3463_s19] sm:$0xf]  ;;  %v2139_v40 = vshrl.u32 %v2138_v39, 7 }
 0xb7c   : > { %v2007_v16 = vld [vmem:[#allocation2] sm:$0xff]  ;;  %2585 = vmatprep.subr.bf16.mxu0 %v2848_v14  ;;  %2593 = vmatprep.mubr.msk.bf16.mxu1 %vm2849_vm9, %v2848_v14 }
 0xb7d   : > { %v2008_v17 = vpack.c.bf16 %v2007_v16, %v2007_v16  ;;  %2727 = vset.pattern.permute.xlu0 %v2850_v19  ;;  %v2140_v41 = vsub.s32 0, %v2139_v40 }
 0xb7e   : > { %2135 = vperm.xlu0 %2727, %v2132_v18  }
 0xb7f   : > { %2586 = vmatpush3.bf16.msra.mxu0 %v2729_v15 }
 0xb82   : > { %2588 = vmatmul.mubr.msk.bf16.vlgmr.msra.gmra.mxu0 %vm1083_vm2, %v2008_v17 }
 0xbf9   : > { %v2136_v42 = vpop.permute.xlu0 %2135 }
 0xbfa   : > { %v2141_v43 = vrot.slane %v2136_v42, %v2140_v41 }
 0xc42   : > { %v2069_v21 = vpop.f32.mrf.mxu0 }
 0xc43   : > { %v2070_v22 = vadd.f32 %v2429_v20, %v2069_v21 }
 0xc44   : > { %v2589_v23 = vpop.f32.mrf.mxu0 }
 0xc45   : > { %v2076_v24 = vmul.f32 0.044715, %v2070_v22  ;;  %v2075_v32 = vmul.f32 0.5, %v2070_v22 }
 0xc46   : > { %v2072_v25 = vpop.f32.mrf.mxu0 }
 0xc47   : > { %v2077_v26 = vmul.f32 %v2076_v24, %v2070_v22 }
 0xc48   : > { %v2590_v27 = vpop.f32.mrf.mxu0 }
 0xc49   : > { %v2078_v28 = vmul.f32 %v2077_v26, %v2070_v22 }
 0xc4b   : > { %v2079_v29 = vadd.f32 %v2078_v28, %v2070_v22 }
 0xc4d   : > { %v2080_v30 = vmul.f32 0.7978846, %v2079_v29 }
 0xc4f   : > { %2730 = vtanh.f32 %v2080_v30 }
 0xc5c   : > { %v2731_v31 = vpop.eup %2730 }
 0xc5d   : > { %v2082_v33 = vadd.f32 1.0, %v2731_v31 }
 0xc5f   : > { %v2083_v34 = vmul.f32 %v2082_v33, %v2075_v32 }
 0xc61   : > { %v2085_v35 = vpack.c.bf16 %v2083_v34, %v2083_v34 }
 0xc63   : > { %v2090_v36 = vsel %vm1083_vm2, %v2085_v35, 0 }
 0xc64   : > { %2592 = vmatpush3.bf16.xpose.msra.mxu1 %v2090_v36 }
 0xc6b   : > { %2594 = vmatmul.mubr.msk.bf16.vlgmr.msra.gmra.mxu1 %vm1083_vm2, %v2084_v37 }
 0xd2b   : > { %v2126_v44 = vpop.f32.mrf.mxu1 }
 0xd2c   : > { %v2142_v45 = vadd.f32 %v2141_v43, %v2126_v44 }
 0xd2d   : > { %v2595_v46 = vpop.f32.mrf.mxu1 }
 0xd2e   : > { %v2143_v47 = vsub.f32 0.0, %v2142_v45 }
 0xd2f   : > { %v2129_v48 = vpop.f32.mrf.mxu1 }
 0xd30   : > { %v2144_v49 = vmul.f32 1.442695, %v2143_v47 }
 0xd31   : > { %v2596_v50 = vpop.f32.mrf.mxu1 }
 0xd32   : > { %2732 = vpow2.f32 %v2144_v49 }
 0xd3f   : > { %v2733_v51 = vpop.eup %2732 }
 0xd40   : > { %v2146_v52 = vadd.f32 1.0, %v2733_v51 }
 0xd42   : > { %2734 = vrcp.f32 %v2146_v52 }
 0xd4f   : > { %v2735_v53 = vpop.eup %2734 }
 0xd50   : > { %2150 = vst.msk [vmem:[%s3124_s7] sm:$0x1] %vm2149_vm10, %v2735_v53 }
 0xd51 PF: > { %s3464_s23 = sld [smem:[#allocation10_spill]]  ;;  %s2164_s6 = sshll.u32 %s3124_s7, 4  ;;  %s2165_s6 = int_to_ptr.vmem [resolvable:$true] %s2164_s6 }
 0xd52   : > { %s3466_s26 = sld [smem:[#allocation36_spill]]  ;;  %s3467_s30 = sand.u32 1, %s2804_s28  }
 0xd53   : > { %s2152_s27 = scalar_lea.sflag [#allocation5], %s3467_s30  ;;  %s2736_s11 = scalar_lea.vmem %s2165_s6, 16 }
 0xd54   : > { %p2737_p2 = scmp.ne.s32.totalorder %s2165_s6, %s2736_s11  ;;  %s2851_s2 = smov [#allocation4]  }
 0xd55   : > { %s2740_s29 = sshll.u32 %s2851_s2, 4  ;;  %s2741_s29 = int_to_ptr.vmem [resolvable:$false] %s2740_s29 }
 0xd56   : > { %p2738_p4 = pnand %p2737_p2, %p3029_p3  ;;  %s2742_s0 = scalar_lea.vmem %s2741_s29, 32 }
 0xd57   : > { %s2434_s3 = sshll.u32 %s3464_s23, 4  ;;  %p2743_p6 = scmp.lt.s32.totalorder %s2165_s6, %s2741_s29 }
 0xd58   : > { %s2162_s24 = scalar_lea.hbm %s3466_s26, %s2434_s3  ;;  %p2739_p5 = pneg %p2738_p4 }
 0xd59   : > { %p2744_p7 = scmp.lt.s32.totalorder %s2742_s0, %s2736_s11 }
 0xd5b   : > { %p2745_p8 = por %p2744_p7, %p2743_p6 }
 0xd5d   : > { %p2746_p10 = pnand %p2745_p8, %p2739_p5 }
 0xd5f   : > { %2749 = shalt.err (!%p2746_p10)
}
 0xd60   : > { %s2750_s8 = scalar_lea.hbm %s2162_s24, 16  ;;  %s2754_s12 = scalar_lea.hbm %s3466_s26, 32 }
 0xd61   : > { %p2751_p11 = scmp.ne.s32.totalorder %s2162_s24, %s2750_s8  ;;  %p2755_p0 = scmp.lt.s32.totalorder %s2162_s24, %s3466_s26 }
 0xd62   : > { %p2756_p1 = scmp.lt.s32.totalorder %s2754_s12, %s2750_s8 }
 0xd63   : > { %p2752_p12 = pnand %p2751_p11, %p3029_p3 }
 0xd64   : > { %p2757_p2 = por %p2756_p1, %p2755_p0 }
 0xd65   : > { %p2753_p13 = pneg %p2752_p12 }
 0xd67   : > { %p2758_p4 = pnand %p2757_p2, %p2753_p13 }
 0xd69   : > { %2761 = shalt.err (!%p2758_p4)
}
 0xd6a   : > { %2597 = dma.vmem_to_hbm [thread:$0]  (%p3029_p3), %s2165_s6, 16, %s2162_s24, %s2152_s27  }
 0xd6b PF: > { %s3468_s18 = sld [smem:[#allocation13_spill]] }
 0xd6c   : > { %s3469_s19 = sld [smem:[#allocation7_spill]] }
 0xd71   : > { %p2603_p5 = scmp.ge.s32.totalorder %s3468_s18, 2 }
 0xd72   : > { %s2176_s3 = sand.u32 1, %s3469_s19  }
 0xd73   : > { %p2600_p6 = pnand %p2603_p5, %p3039_p9  ;;  %s2177_s9 = scalar_lea.sflag [#allocation5], %s2176_s3 }
 0xd75   : > { %p2601_p7 = pneg %p2600_p6 }
 0xd77   : > { %2795 = dma.done.wait (%p2601_p7), %s2177_s9, 16  }
 0xd78   : > { %2797 = vsyncadd (%p2601_p7), %s2177_s9, 4294967280  ;;  %s39_s30 = sadd.s32 1, %s3468_s18   ;;  %s3471_s1 = sld [smem:[#allocation8_spill]] }
 0xd79   : > { %p36_p8 = scmp.ge.s32.totalorder %s39_s30, 6   ;;  %s3472_s6 = sld [smem:[#allocation18_spill]] }
 0xd7a   : > { %s3473_s2 = sld [smem:[#allocation11_spill]]  ;;  %s3477_s27 = smov %s2804_s28 }
 0xd7b   : > { %s3474_s29 = sld [smem:[#allocation12_spill]]  ;;  %38 = sbr.rel (!%p36_p8) target bundleno = 24 (0x18), region = 201 }
 0xd7c   : > { %s3475_s0 = sld [smem:[#allocation14_spill]] }
 0xd7d   : > { %s3476_s7 = sld [smem:[#allocation16_spill]] }
 0xd7e   : > { %s3478_s28 = smov %s3471_s1 }
 0xd80   :  { %2181 = vsyncpa [#allocation5], 1 }
 0xd81   :  { %2183 = vsyncpa [#allocation5 + $0x1], 1 }

</bundles_post_ra>
